<compile_context>
chip_gen: v7x
topology: tpu7x:2x2x1
jax: 0.10.0
libtpu: 0.0.40
codegen_flags: <defaults>
</compile_context>

<pallas_src>
import functools

import jax
import jax.numpy as jnp
from jax import lax
from jax.experimental import pallas as pl
from jax.experimental.pallas import tpu as pltpu

LANE = 128


def _round_up(x, m):
    return (x + m - 1) // m * m


# ----------------------------------------------------------------------------
# Pallas kernel: (tile_m, Kp) @ (Kp, Cp) + bias [+ sigmoid], lane-dense output
# ----------------------------------------------------------------------------
def _matmul_bias_act_kernel(p_ref, w_ref, b_ref, o_ref, *, apply_sigmoid):
    acc = jnp.dot(p_ref[...], w_ref[...], preferred_element_type=jnp.float32)
    acc = acc + b_ref[...]                       # full-lane (tile_m, 128) VPU math
    if apply_sigmoid:
        acc = 1.0 / (1.0 + jnp.exp(-acc))        # exp on the EUP path
    o_ref[...] = acc.astype(o_ref.dtype)


def _matmul_bias_act(p, w, b, *, apply_sigmoid):
    """p: (M, Kp), w: (Kp, Cp), b: (1, Cp) -> (M, Cp).

    Kp and Cp are already 128-aligned. Rows are padded to a sublane-aligned
    tile so every block shape is (8,128)-friendly; the padded rows are sliced
    off on return. Bias add + optional sigmoid are fused into the matmul.
    """
    M, Kp = p.shape
    Cp = w.shape[1]

    tm = min(512, _round_up(M, 8))               # biggest tile that fits easily
    Mp = _round_up(M, tm)
    if Mp != M:
        p = jnp.pad(p, ((0, Mp - M), (0, 0)))    # zero rows -> sliced off below
    grid = (Mp // tm,)

    kernel = functools.partial(_matmul_bias_act_kernel, apply_sigmoid=apply_sigmoid)
    cost = pl.CostEstimate(
        flops=2 * Mp * Kp * Cp,
        transcendentals=(Mp * Cp) if apply_sigmoid else 0,
        bytes_accessed=4 * (Mp * Kp + Kp * Cp + Cp + Mp * Cp),
    )
    out = pl.pallas_call(
        kernel,
        out_shape=jax.ShapeDtypeStruct((Mp, Cp), jnp.float32),
        grid_spec=pltpu.PrefetchScalarGridSpec(
            num_scalar_prefetch=0,
            grid=grid,
            in_specs=[
                pl.BlockSpec((tm, Kp), lambda i: (i, 0)),   # row tile of patches
                pl.BlockSpec((Kp, Cp), lambda i: (0, 0)),   # weights: resident
                pl.BlockSpec((1, Cp), lambda i: (0, 0)),    # bias: resident
            ],
            out_specs=pl.BlockSpec((tm, Cp), lambda i: (i, 0)),
        ),
        compiler_params=pltpu.CompilerParams(
            dimension_semantics=("parallel",),
            vmem_limit_bytes=32 * 1024 * 1024,
        ),
        cost_estimate=cost,
    )(p, w, b)
    return out[:M] if Mp != M else out


# ----------------------------------------------------------------------------
# Glue: host-side im2col (tiny at these sizes), weight packing, padding
# ----------------------------------------------------------------------------
def _im2col(x_nhwc, k, stride):
    """NHWC, pad=k//2 -> (N*Ho*Wo, k*k*C) patch matrix, (kh, kw, c) ordering."""
    N, H, W, C = x_nhwc.shape
    pad = k // 2
    xp = jnp.pad(x_nhwc, ((0, 0), (pad, pad), (pad, pad), (0, 0)))
    Ho = (H + 2 * pad - k) // stride + 1
    Wo = (W + 2 * pad - k) // stride + 1
    cols = []
    for kh in range(k):
        for kw in range(k):
            sl = xp[:, kh: kh + (Ho - 1) * stride + 1: stride,
                    kw: kw + (Wo - 1) * stride + 1: stride, :]
            cols.append(sl)
    patches = jnp.concatenate(cols, axis=-1)            # (N, Ho, Wo, k*k*C)
    return patches.reshape(N * Ho * Wo, k * k * C), (N, Ho, Wo)


def _conv_sigmoid(x_nhwc, w_oihw, bias, *, stride):
    cout, cin, k, _ = w_oihw.shape
    patches, (N, Ho, Wo) = _im2col(x_nhwc, k, stride)
    K = patches.shape[1]
    Kp = _round_up(K, LANE)
    Cp = _round_up(cout, LANE)
    p_pad = jnp.pad(patches, ((0, 0), (0, Kp - K)))
    w_mat = jnp.transpose(w_oihw, (2, 3, 1, 0)).reshape(K, cout)   # (kh,kw,cin)-major
    w_pad = jnp.pad(w_mat, ((0, Kp - K), (0, Cp - cout)))
    b_pad = jnp.pad(bias, (0, Cp - cout)).reshape(1, Cp)
    out = _matmul_bias_act(p_pad, w_pad, b_pad, apply_sigmoid=True)
    return out[:, :cout].reshape(N, Ho, Wo, cout)


def _linear(flat_nhwc, w_fc, b_fc, hwc_shape):
    """flat_nhwc: (N, H*W*C) NHWC-ordered; w_fc: PyTorch (out, C*H*W)."""
    H, W, C = hwc_shape
    num_out = w_fc.shape[0]
    # Absorb the NCHW-vs-NHWC flatten-order difference into the weight.
    w_mat = jnp.transpose(w_fc.reshape(num_out, C, H, W), (2, 3, 1, 0)).reshape(
        H * W * C, num_out)
    K = w_mat.shape[0]
    Kp = _round_up(K, LANE)
    Cp = _round_up(num_out, LANE)
    p_pad = jnp.pad(flat_nhwc, ((0, 0), (0, Kp - K)))
    w_pad = jnp.pad(w_mat, ((0, Kp - K), (0, Cp - num_out)))
    b_pad = jnp.pad(b_fc, (0, Cp - num_out)).reshape(1, Cp)
    out = _matmul_bias_act(p_pad, w_pad, b_pad, apply_sigmoid=False)
    return out[:, :num_out]


def lenet_forward(x_nchw, params):
    x = jnp.transpose(x_nchw, (0, 2, 3, 1))     # single NHWC transpose at entry
    h = _conv_sigmoid(x, params["w1"], params["b1"], stride=2)
    h = _conv_sigmoid(h, params["w2"], params["b2"], stride=2)
    h = _conv_sigmoid(h, params["w3"], params["b3"], stride=1)
    N, Ho, Wo, C = h.shape
    flat = h.reshape(N, Ho * Wo * C)
    return _linear(flat, params["wf"], params["bf"], (Ho, Wo, C))


# ----------------------------------------------------------------------------
# Pure-JAX reference (independent path: lax.conv in NCHW, PyTorch flatten)
# ----------------------------------------------------------------------------
def ref_lenet(x_nchw, params):
    def conv(z, w, b, s):
        out = lax.conv_general_dilated(
            z, w, (s, s), ((2, 2), (2, 2)),
            dimension_numbers=("NCHW", "OIHW", "NCHW"))
        return out + b.reshape(1, -1, 1, 1)

    h = jax.nn.sigmoid(conv(x_nchw, params["w1"], params["b1"], 2))
    h = jax.nn.sigmoid(conv(h, params["w2"], params["b2"], 2))
    h = jax.nn.sigmoid(conv(h, params["w3"], params["b3"], 1))
    flat = h.reshape(h.shape[0], -1)            # NCHW flatten, like .view()
    return flat @ params["wf"].T + params["bf"]


# ----------------------------------------------------------------------------
def make_params(key, channel=3, hidden=768, num_classes=10):
    ks = jax.random.split(key, 8)

    def conv_init(kw, kb, cout, cin, ksz=5):
        bound = 1.0 / float(jnp.sqrt(cin * ksz * ksz))
        w = jax.random.uniform(kw, (cout, cin, ksz, ksz), jnp.float32, -bound, bound)
        b = jax.random.uniform(kb, (cout,), jnp.float32, -bound, bound)
        return w, b

    w1, b1 = conv_init(ks[0], ks[1], 12, channel)
    w2, b2 = conv_init(ks[2], ks[3], 12, 12)
    w3, b3 = conv_init(ks[4], ks[5], 12, 12)
    bound = 1.0 / float(jnp.sqrt(hidden))
    wf = jax.random.uniform(ks[6], (num_classes, hidden), jnp.float32, -bound, bound)
    bf = jax.random.uniform(ks[7], (num_classes,), jnp.float32, -bound, bound)
    return {"w1": w1, "b1": b1, "w2": w2, "b2": b2, "w3": w3, "b3": b3,
            "wf": wf, "bf": bf}


if __name__ == "__main__":
    root = jax.random.PRNGKey(0)
    kx, kp = jax.random.split(root)

    # hideen=768 implies 32x32 input: 12 channels * 8 * 8 after strides 2,2,1.
    x = jax.random.normal(kx, (2, 3, 32, 32), jnp.float32)   # NCHW like PyTorch
    params = make_params(kp, channel=3, hidden=768, num_classes=10)

    fwd = jax.jit(lenet_forward)
    out = fwd(x, params)
    jax.block_until_ready(out)

    ref = ref_lenet(x, params)
    assert out.shape == (2, 10), out.shape
    max_err = float(jnp.max(jnp.abs(out - ref)))
    assert jnp.allclose(out, ref, rtol=1e-3, atol=1e-3), f"mismatch {max_err}"

    print("KERNEL_OK")
</pallas_src>

<mosaic_0001>
module attributes {stable_mosaic.version = 11 : i64} {
  func.func @_matmul_bias_act_kernel(%arg0: i32, %arg1: memref<512x128xf32, #tpu.memory_space<vmem>>, %arg2: memref<128x128xf32, #tpu.memory_space<vmem>>, %arg3: memref<1x128xf32, #tpu.memory_space<vmem>>, %arg4: memref<512x128xf32, #tpu.memory_space<vmem>>) attributes {dimension_semantics = [#tpu.dimension_semantics<parallel>], iteration_bounds = array<i64: 1>, scalar_prefetch = 0 : i64, scratch_operands = 0 : i64, tpu.core_type = #tpu.core_type<tc>, window_params = [{transform_indices = @transform_0, window_bounds = array<i64: 512, 128>}, {pipeline_mode = #tpu.pipeline_mode<synchronous>, transform_indices = @transform_1, window_bounds = array<i64: 128, 128>}, {pipeline_mode = #tpu.pipeline_mode<synchronous>, transform_indices = @transform_2, window_bounds = array<i64: 1, 128>}, {transform_indices = @transform_3, window_bounds = array<i64: 512, 128>}]} {
    %c0 = arith.constant 0 : index
    %c0_0 = arith.constant 0 : index
    %0 = vector.load %arg1[%c0, %c0_0] : memref<512x128xf32, #tpu.memory_space<vmem>>, vector<512x128xf32>
    %c0_1 = arith.constant 0 : index
    %c0_2 = arith.constant 0 : index
    %1 = vector.load %arg2[%c0_1, %c0_2] : memref<128x128xf32, #tpu.memory_space<vmem>>, vector<128x128xf32>
    %cst = arith.constant dense<0.000000e+00> : vector<512x128xf32>
    %2 = tpu.matmul %0, %1, %cst {dimension_numbers = #tpu.dot_dimension_numbers<[1], [0], [0], [1], [0, 0, 1, 1], [], []>} : vector<512x128xf32>, vector<128x128xf32>, vector<512x128xf32> -> vector<512x128xf32>
    %c0_3 = arith.constant 0 : index
    %c0_4 = arith.constant 0 : index
    %3 = vector.load %arg3[%c0_3, %c0_4] : memref<1x128xf32, #tpu.memory_space<vmem>>, vector<1x128xf32>
    %4 = vector.broadcast %3 : vector<1x128xf32> to vector<512x128xf32>
    %5 = arith.addf %2, %4 : vector<512x128xf32>
    %cst_5 = arith.constant 0.000000e+00 : f32
    %6 = vector.broadcast %cst_5 : f32 to vector<512x128xf32>
    %7 = arith.subf %6, %5 : vector<512x128xf32>
    %8 = math.exp %7 : vector<512x128xf32>
    %cst_6 = arith.constant 1.000000e+00 : f32
    %9 = vector.broadcast %cst_6 : f32 to vector<512x128xf32>
    %10 = arith.addf %9, %8 : vector<512x128xf32>
    %cst_7 = arith.constant 1.000000e+00 : f32
    %11 = vector.broadcast %cst_7 : f32 to vector<512x128xf32>
    %12 = arith.divf %11, %10 : vector<512x128xf32>
    %c0_8 = arith.constant 0 : index
    %c0_9 = arith.constant 0 : index
    %13 = vector.load %arg4[%c0_8, %c0_9] : memref<512x128xf32, #tpu.memory_space<vmem>>, vector<512x128xf32>
    tpu.vector_store %arg4[%c0_8, %c0_9], %12 {strides = array<i32>} : memref<512x128xf32, #tpu.memory_space<vmem>>, vector<512x128xf32>,
    return
  }
  func.func @transform_0(%arg0: i32) -> (i32, i32) {
    %c0_i32 = arith.constant 0 : i32
    %c0_i32_0 = arith.constant 0 : i32
    return %arg0, %c0_i32 : i32, i32
  }
  func.func @transform_1(%arg0: i32) -> (i32, i32) {
    %c0_i32 = arith.constant 0 : i32
    %c0_i32_0 = arith.constant 0 : i32
    %c0_i32_1 = arith.constant 0 : i32
    return %c0_i32, %c0_i32_0 : i32, i32
  }
  func.func @transform_2(%arg0: i32) -> (i32, i32) {
    %c0_i32 = arith.constant 0 : i32
    %c0_i32_0 = arith.constant 0 : i32
    %c0_i32_1 = arith.constant 0 : i32
    return %c0_i32, %c0_i32_0 : i32, i32
  }
  func.func @transform_3(%arg0: i32) -> (i32, i32) {
    %c0_i32 = arith.constant 0 : i32
    %c0_i32_0 = arith.constant 0 : i32
    return %arg0, %c0_i32 : i32, i32
  }
}

module attributes {stable_mosaic.version = 11 : i64} {
  func.func @_matmul_bias_act_kernel(%arg0: i32, %arg1: memref<128x384xf32, #tpu.memory_space<vmem>>, %arg2: memref<384x128xf32, #tpu.memory_space<vmem>>, %arg3: memref<1x128xf32, #tpu.memory_space<vmem>>, %arg4: memref<128x128xf32, #tpu.memory_space<vmem>>) attributes {dimension_semantics = [#tpu.dimension_semantics<parallel>], iteration_bounds = array<i64: 1>, scalar_prefetch = 0 : i64, scratch_operands = 0 : i64, tpu.core_type = #tpu.core_type<tc>, window_params = [{transform_indices = @transform_0, window_bounds = array<i64: 128, 384>}, {pipeline_mode = #tpu.pipeline_mode<synchronous>, transform_indices = @transform_1, window_bounds = array<i64: 384, 128>}, {pipeline_mode = #tpu.pipeline_mode<synchronous>, transform_indices = @transform_2, window_bounds = array<i64: 1, 128>}, {transform_indices = @transform_3, window_bounds = array<i64: 128, 128>}]} {
    %c0 = arith.constant 0 : index
    %c0_0 = arith.constant 0 : index
    %0 = vector.load %arg1[%c0, %c0_0] : memref<128x384xf32, #tpu.memory_space<vmem>>, vector<128x384xf32>
    %c0_1 = arith.constant 0 : index
    %c0_2 = arith.constant 0 : index
    %1 = vector.load %arg2[%c0_1, %c0_2] : memref<384x128xf32, #tpu.memory_space<vmem>>, vector<384x128xf32>
    %cst = arith.constant dense<0.000000e+00> : vector<128x128xf32>
    %2 = tpu.matmul %0, %1, %cst {dimension_numbers = #tpu.dot_dimension_numbers<[1], [0], [0], [1], [0, 0, 1, 1], [], []>} : vector<128x384xf32>, vector<384x128xf32>, vector<128x128xf32> -> vector<128x128xf32>
    %c0_3 = arith.constant 0 : index
    %c0_4 = arith.constant 0 : index
    %3 = vector.load %arg3[%c0_3, %c0_4] : memref<1x128xf32, #tpu.memory_space<vmem>>, vector<1x128xf32>
    %4 = vector.broadcast %3 : vector<1x128xf32> to vector<128x128xf32>
    %5 = arith.addf %2, %4 : vector<128x128xf32>
    %cst_5 = arith.constant 0.000000e+00 : f32
    %6 = vector.broadcast %cst_5 : f32 to vector<128x128xf32>
    %7 = arith.subf %6, %5 : vector<128x128xf32>
    %8 = math.exp %7 : vector<128x128xf32>
    %cst_6 = arith.constant 1.000000e+00 : f32
    %9 = vector.broadcast %cst_6 : f32 to vector<128x128xf32>
    %10 = arith.addf %9, %8 : vector<128x128xf32>
    %cst_7 = arith.constant 1.000000e+00 : f32
    %11 = vector.broadcast %cst_7 : f32 to vector<128x128xf32>
    %12 = arith.divf %11, %10 : vector<128x128xf32>
    %c0_8 = arith.constant 0 : index
    %c0_9 = arith.constant 0 : index
    %13 = vector.load %arg4[%c0_8, %c0_9] : memref<128x128xf32, #tpu.memory_space<vmem>>, vector<128x128xf32>
    tpu.vector_store %arg4[%c0_8, %c0_9], %12 {strides = array<i32>} : memref<128x128xf32, #tpu.memory_space<vmem>>, vector<128x128xf32>,
    return
  }
  func.func @transform_0(%arg0: i32) -> (i32, i32) {
    %c0_i32 = arith.constant 0 : i32
    %c0_i32_0 = arith.constant 0 : i32
    return %arg0, %c0_i32 : i32, i32
  }
  func.func @transform_1(%arg0: i32) -> (i32, i32) {
    %c0_i32 = arith.constant 0 : i32
    %c0_i32_0 = arith.constant 0 : i32
    %c0_i32_1 = arith.constant 0 : i32
    return %c0_i32, %c0_i32_0 : i32, i32
  }
  func.func @transform_2(%arg0: i32) -> (i32, i32) {
    %c0_i32 = arith.constant 0 : i32
    %c0_i32_0 = arith.constant 0 : i32
    %c0_i32_1 = arith.constant 0 : i32
    return %c0_i32, %c0_i32_0 : i32, i32
  }
  func.func @transform_3(%arg0: i32) -> (i32, i32) {
    %c0_i32 = arith.constant 0 : i32
    %c0_i32_0 = arith.constant 0 : i32
    return %arg0, %c0_i32 : i32, i32
  }
}

module attributes {stable_mosaic.version = 11 : i64} {
  func.func @_matmul_bias_act_kernel(%arg0: i32, %arg1: memref<8x768xf32, #tpu.memory_space<vmem>>, %arg2: memref<768x128xf32, #tpu.memory_space<vmem>>, %arg3: memref<1x128xf32, #tpu.memory_space<vmem>>, %arg4: memref<8x128xf32, #tpu.memory_space<vmem>>) attributes {dimension_semantics = [#tpu.dimension_semantics<parallel>], iteration_bounds = array<i64: 1>, scalar_prefetch = 0 : i64, scratch_operands = 0 : i64, tpu.core_type = #tpu.core_type<tc>, window_params = [{transform_indices = @transform_0, window_bounds = array<i64: 8, 768>}, {pipeline_mode = #tpu.pipeline_mode<synchronous>, transform_indices = @transform_1, window_bounds = array<i64: 768, 128>}, {pipeline_mode = #tpu.pipeline_mode<synchronous>, transform_indices = @transform_2, window_bounds = array<i64: 1, 128>}, {transform_indices = @transform_3, window_bounds = array<i64: 8, 128>}]} {
    %c0 = arith.constant 0 : index
    %c0_0 = arith.constant 0 : index
    %0 = vector.load %arg1[%c0, %c0_0] : memref<8x768xf32, #tpu.memory_space<vmem>>, vector<8x768xf32>
    %c0_1 = arith.constant 0 : index
    %c0_2 = arith.constant 0 : index
    %1 = vector.load %arg2[%c0_1, %c0_2] : memref<768x128xf32, #tpu.memory_space<vmem>>, vector<768x128xf32>
    %cst = arith.constant dense<0.000000e+00> : vector<8x128xf32>
    %2 = tpu.matmul %0, %1, %cst {dimension_numbers = #tpu.dot_dimension_numbers<[1], [0], [0], [1], [0, 0, 1, 1], [], []>} : vector<8x768xf32>, vector<768x128xf32>, vector<8x128xf32> -> vector<8x128xf32>
    %c0_3 = arith.constant 0 : index
    %c0_4 = arith.constant 0 : index
    %3 = vector.load %arg3[%c0_3, %c0_4] : memref<1x128xf32, #tpu.memory_space<vmem>>, vector<1x128xf32>
    %4 = vector.broadcast %3 : vector<1x128xf32> to vector<8x128xf32>
    %5 = arith.addf %2, %4 : vector<8x128xf32>
    %c0_5 = arith.constant 0 : index
    %c0_6 = arith.constant 0 : index
    %6 = vector.load %arg4[%c0_5, %c0_6] : memref<8x128xf32, #tpu.memory_space<vmem>>, vector<8x128xf32>
    tpu.vector_store %arg4[%c0_5, %c0_6], %5 {strides = array<i32>} : memref<8x128xf32, #tpu.memory_space<vmem>>, vector<8x128xf32>,
    return
  }
  func.func @transform_0(%arg0: i32) -> (i32, i32) {
    %c0_i32 = arith.constant 0 : i32
    %c0_i32_0 = arith.constant 0 : i32
    return %arg0, %c0_i32 : i32, i32
  }
  func.func @transform_1(%arg0: i32) -> (i32, i32) {
    %c0_i32 = arith.constant 0 : i32
    %c0_i32_0 = arith.constant 0 : i32
    %c0_i32_1 = arith.constant 0 : i32
    return %c0_i32, %c0_i32_0 : i32, i32
  }
  func.func @transform_2(%arg0: i32) -> (i32, i32) {
    %c0_i32 = arith.constant 0 : i32
    %c0_i32_0 = arith.constant 0 : i32
    %c0_i32_1 = arith.constant 0 : i32
    return %c0_i32, %c0_i32_0 : i32, i32
  }
  func.func @transform_3(%arg0: i32) -> (i32, i32) {
    %c0_i32 = arith.constant 0 : i32
    %c0_i32_0 = arith.constant 0 : i32
    return %arg0, %c0_i32 : i32, i32
  }
}

</mosaic_0001>

<bundles_post_ra>
// kernel: lenet_forward.4
= control target key start
LH: loop header
LB: loop body
LE: loop exit
PB: predicated region body
PF: predicated region fallthrough
CT: control target
= control target key end

     0   :  { %s2089_s1 = inlined_call_operand.vmem [shape: f32[128,128], index: 1, kind: input, shape index: {}]   ;;  %s2090_s0 = inlined_call_operand.vmem [shape: f32[512,128], index: 0, kind: input, shape index: {}]   ;;  %s2091_s2 = inlined_call_operand.vmem [shape: f32[1,128], index: 2, kind: input, shape index: {}]   ;;  %s2092_s3 = inlined_call_operand.vmem [shape: f32[512,128], index: 3, kind: output, shape index: {}]  }
   0x1   :  { %v78_v0 = vld [vmem:[%s2089_s1] sm:$0xff]  ;;  %v79_v1 = vld [vmem:[%s2089_s1 + $0x8] sm:$0xff]  ;;  %v80_v2 = vld [vmem:[%s2089_s1 + $0x10] sm:$0xff] }
   0x2   :  { %v1147_v3 = vpack.c.bf16 %v79_v1, %v78_v0  ;;  %v81_v4 = vld [vmem:[%s2089_s1 + $0x18] sm:$0xff]  ;;  %v82_v6 = vld [vmem:[%s2089_s1 + $0x20] sm:$0xff]  ;;  %v83_v7 = vld [vmem:[%s2089_s1 + $0x28] sm:$0xff] }
   0x3   :  { %v1151_v5 = vpack.c.bf16 %v81_v4, %v80_v2  ;;  %v1155_v8 = vpack.c.bf16 %v83_v7, %v82_v6  ;;  %v14_v9 = vld [vmem:[%s2090_s0] sm:$0xff]  ;;  %v84_v11 = vld [vmem:[%s2089_s1 + $0x30] sm:$0xff]  ;;  %v85_v12 = vld [vmem:[%s2089_s1 + $0x38] sm:$0xff] }
   0x4   :  { %1148 = vmatprep.subr.bf16.mxu0 %v1147_v3  ;;  %1179 = vmatprep.subr.bf16.mxu1 %v1147_v3  ;;  %v46_v10 = vld [vmem:[%s2090_s0 + $0x100] sm:$0xff]  ;;  %v1159_v13 = vpack.c.bf16 %v85_v12, %v84_v11  ;;  %v87_v15 = vld [vmem:[%s2089_s1 + $0x48] sm:$0xff]  ;;  %v88_v17 = vld [vmem:[%s2089_s1 + $0x50] sm:$0xff] }
   0x5   :  { %1150 = vmatpush3.bf16.msra.mxu0 %v1147_v3  ;;  %1187 = vmatpush3.bf16.msra.mxu1 %v1147_v3  ;;  %v86_v14 = vld [vmem:[%s2089_s1 + $0x40] sm:$0xff]  ;;  %v89_v18 = vld [vmem:[%s2089_s1 + $0x58] sm:$0xff]  ;;  %v91_v21 = vld [vmem:[%s2089_s1 + $0x68] sm:$0xff] }
   0x6   :  { %1152 = vmatprep.subr.bf16.mxu0 %v1151_v5  ;;  %1180 = vmatprep.subr.bf16.mxu1 %v1151_v5  ;;  %v1163_v16 = vpack.c.bf16 %v87_v15, %v86_v14  ;;  %v1167_v19 = vpack.c.bf16 %v89_v18, %v88_v17  ;;  %v90_v20 = vld [vmem:[%s2089_s1 + $0x60] sm:$0xff]  ;;  %v92_v23 = vld [vmem:[%s2089_s1 + $0x70] sm:$0xff]  ;;  %v93_v24 = vld [vmem:[%s2089_s1 + $0x78] sm:$0xff] }
   0x7   :  { %1051 = vmatprep.mubr.f32.mxu0 %v14_v9  ;;  %1099 = vmatprep.mubr.f32.mxu1 %v46_v10  ;;  %v1171_v22 = vpack.c.bf16 %v91_v21, %v90_v20  ;;  %v1175_v25 = vpack.c.bf16 %v93_v24, %v92_v23  ;;  %v15_v26 = vld [vmem:[%s2090_s0 + $0x8] sm:$0xff]  ;;  %v16_v28 = vld [vmem:[%s2090_s0 + $0x10] sm:$0xff]  ;;  %v17_v30 = vld [vmem:[%s2090_s0 + $0x18] sm:$0xff] }
   0x8   :  { %v47_v27 = vld [vmem:[%s2090_s0 + $0x108] sm:$0xff]  ;;  %v48_v29 = vld [vmem:[%s2090_s0 + $0x110] sm:$0xff]  ;;  %v49_v31 = vld [vmem:[%s2090_s0 + $0x118] sm:$0xff] }
   0x9   :  { %1154 = vmatpush3.bf16.msra.mxu0 %v1151_v5  ;;  %1188 = vmatpush3.bf16.msra.mxu1 %v1151_v5  ;;  %v18_v32 = vld [vmem:[%s2090_s0 + $0x20] sm:$0xff]  ;;  %v19_v34 = vld [vmem:[%s2090_s0 + $0x28] sm:$0xff]  ;;  %v20_v36 = vld [vmem:[%s2090_s0 + $0x30] sm:$0xff] }
   0xa   :  { %1156 = vmatprep.subr.bf16.mxu0 %v1155_v8  ;;  %1181 = vmatprep.subr.bf16.mxu1 %v1155_v8  ;;  %v50_v33 = vld [vmem:[%s2090_s0 + $0x120] sm:$0xff]  ;;  %v51_v35 = vld [vmem:[%s2090_s0 + $0x128] sm:$0xff]  ;;  %v52_v37 = vld [vmem:[%s2090_s0 + $0x130] sm:$0xff] }
   0xb   :  { %v21_v38 = vld [vmem:[%s2090_s0 + $0x38] sm:$0xff]  ;;  %v22_v40 = vld [vmem:[%s2090_s0 + $0x40] sm:$0xff]  ;;  %v23_v42 = vld [vmem:[%s2090_s0 + $0x48] sm:$0xff] }
   0xc   :  { %v53_v39 = vld [vmem:[%s2090_s0 + $0x138] sm:$0xff]  ;;  %v54_v41 = vld [vmem:[%s2090_s0 + $0x140] sm:$0xff]  ;;  %v55_v43 = vld [vmem:[%s2090_s0 + $0x148] sm:$0xff] }
   0xd   :  { %1158 = vmatpush3.bf16.msra.mxu0 %v1155_v8  ;;  %1189 = vmatpush3.bf16.msra.mxu1 %v1155_v8  ;;  %v24_v44 = vld [vmem:[%s2090_s0 + $0x50] sm:$0xff]  ;;  %v25_v46 = vld [vmem:[%s2090_s0 + $0x58] sm:$0xff]  ;;  %v26_v48 = vld [vmem:[%s2090_s0 + $0x60] sm:$0xff] }
   0xe   :  { %1160 = vmatprep.subr.bf16.mxu0 %v1159_v13  ;;  %1182 = vmatprep.subr.bf16.mxu1 %v1159_v13  ;;  %v56_v45 = vld [vmem:[%s2090_s0 + $0x150] sm:$0xff]  ;;  %v57_v47 = vld [vmem:[%s2090_s0 + $0x158] sm:$0xff]  ;;  %v58_v49 = vld [vmem:[%s2090_s0 + $0x160] sm:$0xff] }
   0xf   :  { %v27_v50 = vld [vmem:[%s2090_s0 + $0x68] sm:$0xff]  ;;  %v28_v52 = vld [vmem:[%s2090_s0 + $0x70] sm:$0xff]  ;;  %v29_v54 = vld [vmem:[%s2090_s0 + $0x78] sm:$0xff] }
  0x10   :  { %v59_v51 = vld [vmem:[%s2090_s0 + $0x168] sm:$0xff]  ;;  %v60_v53 = vld [vmem:[%s2090_s0 + $0x170] sm:$0xff]  ;;  %v61_v55 = vld [vmem:[%s2090_s0 + $0x178] sm:$0xff] }
  0x11   :  { %1162 = vmatpush3.bf16.msra.mxu0 %v1159_v13  ;;  %1190 = vmatpush3.bf16.msra.mxu1 %v1159_v13  ;;  %v30_v56 = vld [vmem:[%s2090_s0 + $0x80] sm:$0xff]  ;;  %v31_v58 = vld [vmem:[%s2090_s0 + $0x88] sm:$0xff]  ;;  %v32_v60 = vld [vmem:[%s2090_s0 + $0x90] sm:$0xff] }
  0x12   :  { %1164 = vmatprep.subr.bf16.mxu0 %v1163_v16  ;;  %1183 = vmatprep.subr.bf16.mxu1 %v1163_v16  ;;  %v62_v57 = vld [vmem:[%s2090_s0 + $0x180] sm:$0xff]  ;;  %v63_v59 = vld [vmem:[%s2090_s0 + $0x188] sm:$0xff]  ;;  %v64_v61 = vld [vmem:[%s2090_s0 + $0x190] sm:$0xff] }
  0x13   :  { %v33_v62 = vld [vmem:[%s2090_s0 + $0x98] sm:$0xff]  ;;  %v34_v0 = vld [vmem:[%s2090_s0 + $0xa0] sm:$0xff]  ;;  %v35_v2 = vld [vmem:[%s2090_s0 + $0xa8] sm:$0xff] }
  0x14   :  { %v65_v63 = vld [vmem:[%s2090_s0 + $0x198] sm:$0xff]  ;;  %v66_v1 = vld [vmem:[%s2090_s0 + $0x1a0] sm:$0xff]  ;;  %v67_v3 = vld [vmem:[%s2090_s0 + $0x1a8] sm:$0xff] }
  0x15   :  { %1166 = vmatpush3.bf16.msra.mxu0 %v1163_v16  ;;  %1191 = vmatpush3.bf16.msra.mxu1 %v1163_v16  ;;  %v36_v4 = vld [vmem:[%s2090_s0 + $0xb0] sm:$0xff]  ;;  %v37_v6 = vld [vmem:[%s2090_s0 + $0xb8] sm:$0xff]  ;;  %v38_v8 = vld [vmem:[%s2090_s0 + $0xc0] sm:$0xff] }
  0x16   :  { %1168 = vmatprep.subr.bf16.mxu0 %v1167_v19  ;;  %1184 = vmatprep.subr.bf16.mxu1 %v1167_v19  ;;  %v68_v5 = vld [vmem:[%s2090_s0 + $0x1b0] sm:$0xff]  ;;  %v69_v7 = vld [vmem:[%s2090_s0 + $0x1b8] sm:$0xff]  ;;  %v70_v9 = vld [vmem:[%s2090_s0 + $0x1c0] sm:$0xff] }
  0x17   :  { %v39_v10 = vld [vmem:[%s2090_s0 + $0xc8] sm:$0xff]  ;;  %v40_v12 = vld [vmem:[%s2090_s0 + $0xd0] sm:$0xff]  ;;  %v41_v14 = vld [vmem:[%s2090_s0 + $0xd8] sm:$0xff] }
  0x18   :  { %v71_v11 = vld [vmem:[%s2090_s0 + $0x1c8] sm:$0xff]  ;;  %v72_v13 = vld [vmem:[%s2090_s0 + $0x1d0] sm:$0xff]  ;;  %v73_v15 = vld [vmem:[%s2090_s0 + $0x1d8] sm:$0xff] }
  0x19   :  { %1170 = vmatpush3.bf16.msra.mxu0 %v1167_v19  ;;  %1192 = vmatpush3.bf16.msra.mxu1 %v1167_v19  ;;  %v42_v16 = vld [vmem:[%s2090_s0 + $0xe0] sm:$0xff]  ;;  %v43_v18 = vld [vmem:[%s2090_s0 + $0xe8] sm:$0xff]  ;;  %v44_v20 = vld [vmem:[%s2090_s0 + $0xf0] sm:$0xff] }
  0x1a   :  { %1172 = vmatprep.subr.bf16.mxu0 %v1171_v22  ;;  %1185 = vmatprep.subr.bf16.mxu1 %v1171_v22  ;;  %v74_v17 = vld [vmem:[%s2090_s0 + $0x1e0] sm:$0xff]  ;;  %v75_v19 = vld [vmem:[%s2090_s0 + $0x1e8] sm:$0xff]  ;;  %v76_v21 = vld [vmem:[%s2090_s0 + $0x1f0] sm:$0xff] }
  0x1b   :  { %v77_v23 = vld [vmem:[%s2090_s0 + $0x1f8] sm:$0xff]  ;;  %v1715_v24 = vld [vmem:[%s2091_s2] ss:$0 sm:$0xff] }
  0x1d   :  { %1174 = vmatpush3.bf16.msra.mxu0 %v1171_v22  ;;  %1193 = vmatpush3.bf16.msra.mxu1 %v1171_v22  ;;  %v45_v22 = vld [vmem:[%s2090_s0 + $0xf8] sm:$0xff] }
  0x1e   :  { %1176 = vmatprep.subr.bf16.mxu0 %v1175_v25  ;;  %1186 = vmatprep.subr.bf16.mxu1 %v1175_v25 }
  0x21   :  { %1178 = vmatpush3.bf16.msra.mxu0 %v1175_v25  ;;  %1194 = vmatpush3.bf16.msra.mxu1 %v1175_v25 }
  0x24   :  { %1052 = vmatmul.mubr.f32.vlgmr.msra.gmra.mrb[0].mxu0 %v15_v26  ;;  %1100 = vmatmul.mubr.f32.vlgmr.msra.gmra.mrb[0].mxu1 %v47_v27 }
  0x25   :  { %1054 = vmatprep.mubr.f32.mxu0 %v16_v28  ;;  %1102 = vmatprep.mubr.f32.mxu1 %v48_v29 }
  0x28   :  { %1055 = vmatmul.mubr.f32.gmra.mrb[2].mxu0 %v17_v30  ;;  %1103 = vmatmul.mubr.f32.gmra.mrb[2].mxu1 %v49_v31 }
  0x29   :  { %1057 = vmatprep.mubr.f32.mxu0 %v18_v32  ;;  %1105 = vmatprep.mubr.f32.mxu1 %v50_v33 }
  0x2c   :  { %1058 = vmatmul.mubr.f32.gmra.mrb[4].mxu0 %v19_v34  ;;  %1106 = vmatmul.mubr.f32.gmra.mrb[4].mxu1 %v51_v35 }
  0x2d   :  { %1060 = vmatprep.mubr.f32.mxu0 %v20_v36  ;;  %1108 = vmatprep.mubr.f32.mxu1 %v52_v37 }
  0x30   :  { %1061 = vmatmul.mubr.f32.gmra.mrb[6].mxu0 %v21_v38  ;;  %1109 = vmatmul.mubr.f32.gmra.mrb[6].mxu1 %v53_v39 }
  0x31   :  { %1063 = vmatprep.mubr.f32.mxu0 %v22_v40  ;;  %1111 = vmatprep.mubr.f32.mxu1 %v54_v41 }
  0x34   :  { %1064 = vmatmul.mubr.f32.gmra.mrb[8].mxu0 %v23_v42  ;;  %1112 = vmatmul.mubr.f32.gmra.mrb[8].mxu1 %v55_v43 }
  0x35   :  { %1066 = vmatprep.mubr.f32.mxu0 %v24_v44  ;;  %1114 = vmatprep.mubr.f32.mxu1 %v56_v45 }
  0x38   :  { %1067 = vmatmul.mubr.f32.gmra.mrb[10].mxu0 %v25_v46  ;;  %1115 = vmatmul.mubr.f32.gmra.mrb[10].mxu1 %v57_v47 }
  0x39   :  { %1069 = vmatprep.mubr.f32.mxu0 %v26_v48  ;;  %1117 = vmatprep.mubr.f32.mxu1 %v58_v49 }
  0x3c   :  { %1070 = vmatmul.mubr.f32.gmra.mrb[12].mxu0 %v27_v50  ;;  %1118 = vmatmul.mubr.f32.gmra.mrb[12].mxu1 %v59_v51 }
  0x3d   :  { %1072 = vmatprep.mubr.f32.mxu0 %v28_v52  ;;  %1120 = vmatprep.mubr.f32.mxu1 %v60_v53 }
  0x40   :  { %1073 = vmatmul.mubr.f32.gmra.mrb[14].mxu0 %v29_v54  ;;  %1121 = vmatmul.mubr.f32.gmra.mrb[14].mxu1 %v61_v55 }
  0x41   :  { %1075 = vmatprep.mubr.f32.mxu0 %v30_v56  ;;  %1123 = vmatprep.mubr.f32.mxu1 %v62_v57 }
  0x44   :  { %1076 = vmatmul.mubr.f32.gmra.mrb[16].mxu0 %v31_v58  ;;  %1124 = vmatmul.mubr.f32.gmra.mrb[16].mxu1 %v63_v59 }
  0x45   :  { %1078 = vmatprep.mubr.f32.mxu0 %v32_v60  ;;  %1126 = vmatprep.mubr.f32.mxu1 %v64_v61 }
  0x48   :  { %1079 = vmatmul.mubr.f32.gmra.mrb[18].mxu0 %v33_v62  ;;  %1127 = vmatmul.mubr.f32.gmra.mrb[18].mxu1 %v65_v63 }
  0x49   :  { %1081 = vmatprep.mubr.f32.mxu0 %v34_v0  ;;  %1129 = vmatprep.mubr.f32.mxu1 %v66_v1 }
  0x4c   :  { %1082 = vmatmul.mubr.f32.gmra.mrb[20].mxu0 %v35_v2  ;;  %1130 = vmatmul.mubr.f32.gmra.mrb[20].mxu1 %v67_v3 }
  0x4d   :  { %1084 = vmatprep.mubr.f32.mxu0 %v36_v4  ;;  %1132 = vmatprep.mubr.f32.mxu1 %v68_v5 }
  0x50   :  { %1085 = vmatmul.mubr.f32.gmra.mrb[22].mxu0 %v37_v6  ;;  %1133 = vmatmul.mubr.f32.gmra.mrb[22].mxu1 %v69_v7 }
  0x51   :  { %1087 = vmatprep.mubr.f32.mxu0 %v38_v8  ;;  %1135 = vmatprep.mubr.f32.mxu1 %v70_v9 }
  0x54   :  { %1088 = vmatmul.mubr.f32.gmra.mrb[24].mxu0 %v39_v10  ;;  %1136 = vmatmul.mubr.f32.gmra.mrb[24].mxu1 %v71_v11 }
  0x55   :  { %1090 = vmatprep.mubr.f32.mxu0 %v40_v12  ;;  %1138 = vmatprep.mubr.f32.mxu1 %v72_v13 }
  0x58   :  { %1091 = vmatmul.mubr.f32.gmra.mrb[26].mxu0 %v41_v14  ;;  %1139 = vmatmul.mubr.f32.gmra.mrb[26].mxu1 %v73_v15 }
  0x59   :  { %1093 = vmatprep.mubr.f32.mxu0 %v42_v16  ;;  %1141 = vmatprep.mubr.f32.mxu1 %v74_v17 }
  0x5c   :  { %1094 = vmatmul.mubr.f32.gmra.mrb[28].mxu0 %v43_v18  ;;  %1142 = vmatmul.mubr.f32.gmra.mrb[28].mxu1 %v75_v19 }
  0x5d   :  { %1096 = vmatprep.mubr.f32.mxu0 %v44_v20  ;;  %1144 = vmatprep.mubr.f32.mxu1 %v76_v21 }
  0x60   :  { %1097 = vmatmul.mubr.f32.gmra.mrb[30].mxu0 %v45_v22  ;;  %1145 = vmatmul.mubr.f32.gmra.mrb[30].mxu1 %v77_v23 }
  0xf7   :  { %v1053_v25 = vpop.f32.mrb[0].mxu0  ;;  %v1101_v26 = vpop.f32.mrb[0].mxu1 }
  0xf8   :  { %v173_v27 = vadd.f32 %v1053_v25, %v1715_v24  ;;  %v333_v28 = vadd.f32 %v1101_v26, %v1715_v24  ;;  %v167_v29 = vpop.f32.mrb[1].mxu0  ;;  %v327_v30 = vpop.f32.mrb[1].mxu1 }
  0xf9   :  { %v168_v31 = vadd.f32 %v1715_v24, %v167_v29  ;;  %v328_v32 = vadd.f32 %v1715_v24, %v327_v30 }
  0xfa   :  { %v487_v33 = vsub.f32 0.0, %v173_v27  ;;  %v519_v34 = vsub.f32 0.0, %v333_v28 }
  0xfb   :  { %v486_v35 = vsub.f32 0.0, %v168_v31  ;;  %v518_v36 = vsub.f32 0.0, %v328_v32  ;;  %v1056_v37 = vpop.f32.mrb[2].mxu0  ;;  %v1104_v38 = vpop.f32.mrb[2].mxu1 }
  0xfc   :  { %v552_v39 = vmul.f32 1.442695, %v487_v33  ;;  %v616_v40 = vmul.f32 1.442695, %v519_v34  ;;  %v183_v41 = vadd.f32 %v1056_v37, %v1715_v24  ;;  %v343_v42 = vadd.f32 %v1104_v38, %v1715_v24  ;;  %v177_v43 = vpop.f32.mrb[3].mxu0  ;;  %v337_v44 = vpop.f32.mrb[3].mxu1 }
  0xfd   :  { %v550_v45 = vmul.f32 1.442695, %v486_v35  ;;  %v614_v46 = vmul.f32 1.442695, %v518_v36  ;;  %v178_v47 = vadd.f32 %v1715_v24, %v177_v43  ;;  %v338_v48 = vadd.f32 %v1715_v24, %v337_v44 }
  0xfe   :  { %1195 = vpow2.f32 %v552_v39  ;;  %v489_v49 = vsub.f32 0.0, %v183_v41  ;;  %v521_v50 = vsub.f32 0.0, %v343_v42 }
  0xff   :  { %1197 = vpow2.f32 %v616_v40  ;;  %v488_v51 = vsub.f32 0.0, %v178_v47  ;;  %v520_v52 = vsub.f32 0.0, %v338_v48  ;;  %v1059_v53 = vpop.f32.mrb[4].mxu0  ;;  %v1107_v54 = vpop.f32.mrb[4].mxu1 }
 0x100   :  { %1199 = vpow2.f32 %v550_v45  ;;  %v556_v55 = vmul.f32 1.442695, %v489_v49  ;;  %v620_v56 = vmul.f32 1.442695, %v521_v50  ;;  %v193_v57 = vadd.f32 %v1059_v53, %v1715_v24  ;;  %v187_v58 = vpop.f32.mrb[5].mxu0  ;;  %v347_v59 = vpop.f32.mrb[5].mxu1 }
 0x101   :  { %1201 = vpow2.f32 %v614_v46  ;;  %v554_v60 = vmul.f32 1.442695, %v488_v51  ;;  %v618_v61 = vmul.f32 1.442695, %v520_v52  ;;  %v353_v62 = vadd.f32 %v1107_v54, %v1715_v24 }
 0x102   :  { %1203 = vpow2.f32 %v556_v55  ;;  %v491_v63 = vsub.f32 0.0, %v193_v57  ;;  %v188_v0 = vadd.f32 %v1715_v24, %v187_v58  ;;  %v348_v1 = vadd.f32 %v1715_v24, %v347_v59 }
 0x103   :  { %1205 = vpow2.f32 %v620_v56  ;;  %v523_v2 = vsub.f32 0.0, %v353_v62  ;;  %v1062_v3 = vpop.f32.mrb[6].mxu0  ;;  %v1110_v4 = vpop.f32.mrb[6].mxu1 }
 0x104   :  { %1207 = vpow2.f32 %v554_v60  ;;  %v560_v5 = vmul.f32 1.442695, %v491_v63  ;;  %v490_v6 = vsub.f32 0.0, %v188_v0  ;;  %v522_v7 = vsub.f32 0.0, %v348_v1  ;;  %v197_v8 = vpop.f32.mrb[7].mxu0  ;;  %v357_v9 = vpop.f32.mrb[7].mxu1 }
 0x105   :  { %1209 = vpow2.f32 %v618_v61  ;;  %v624_v10 = vmul.f32 1.442695, %v523_v2  ;;  %v203_v16 = vadd.f32 %v1062_v3, %v1715_v24  ;;  %v363_v21 = vadd.f32 %v1110_v4, %v1715_v24 }
 0x106   :  { %1211 = vpow2.f32 %v560_v5  ;;  %v558_v11 = vmul.f32 1.442695, %v490_v6  ;;  %v622_v12 = vmul.f32 1.442695, %v522_v7  ;;  %v198_v27 = vadd.f32 %v1715_v24, %v197_v8 }
 0x107   :  { %1213 = vpow2.f32 %v624_v10  ;;  %v1065_v13 = vpop.f32.mrb[8].mxu0  ;;  %v1113_v14 = vpop.f32.mrb[8].mxu1  ;;  %v493_v32 = vsub.f32 0.0, %v203_v16  ;;  %v525_v36 = vsub.f32 0.0, %v363_v21  ;;  %v358_v40 = vadd.f32 %v1715_v24, %v357_v9 }
 0x108   :  { %v1196_v15 = vpop.eup %1195  ;;  %1215 = vpow2.f32 %v558_v11  ;;  %v207_v17 = vpop.f32.mrb[9].mxu0  ;;  %v492_v43 = vsub.f32 0.0, %v198_v27  ;;  %v213_v44 = vadd.f32 %v1065_v13, %v1715_v24  ;;  %v373_v50 = vadd.f32 %v1113_v14, %v1715_v24 }
 0x109   :  { %v367_v18 = vpop.f32.mrb[9].mxu1  ;;  %v1198_v19 = vpop.eup %1197  ;;  %v679_v20 = vadd.f32 1.0, %v1196_v15  ;;  %1217 = vpow2.f32 %v622_v12  ;;  %v564_v49 = vmul.f32 1.442695, %v493_v32  ;;  %v628_v55 = vmul.f32 1.442695, %v525_v36 }
 0x10a   :  { %v1200_v22 = vpop.eup %1199  ;;  %v711_v23 = vadd.f32 1.0, %v1198_v19  ;;  %v208_v56 = vadd.f32 %v1715_v24, %v207_v17  ;;  %v524_v59 = vsub.f32 0.0, %v358_v40  ;;  %v368_v60 = vadd.f32 %v1715_v24, %v367_v18 }
 0x10b   :  { %v1202_v25 = vpop.eup %1201  ;;  %1219 = vrcp.f32 %v679_v20  ;;  %v678_v26 = vadd.f32 1.0, %v1200_v22  ;;  %v1068_v28 = vpop.f32.mrb[10].mxu0  ;;  %v495_v63 = vsub.f32 0.0, %v213_v44  ;;  %v527_v4 = vsub.f32 0.0, %v373_v50 }
 0x10c   :  { %v1116_v29 = vpop.f32.mrb[10].mxu1  ;;  %v1204_v30 = vpop.eup %1203  ;;  %1221 = vrcp.f32 %v711_v23  ;;  %v710_v31 = vadd.f32 1.0, %v1202_v25  ;;  %v223_v0 = vadd.f32 %v1068_v28, %v1715_v24  ;;  %v562_v9 = vmul.f32 1.442695, %v492_v43 }
 0x10d   :  { %v217_v33 = vpop.f32.mrb[11].mxu0  ;;  %v1206_v34 = vpop.eup %1205  ;;  %1223 = vrcp.f32 %v678_v26  ;;  %v681_v35 = vadd.f32 1.0, %v1204_v30  ;;  %v383_v5 = vadd.f32 %v1116_v29, %v1715_v24  ;;  %v494_v10 = vsub.f32 0.0, %v208_v56 }
 0x10e   :  { %v377_v37 = vpop.f32.mrb[11].mxu1  ;;  %v1208_v38 = vpop.eup %1207  ;;  %1225 = vrcp.f32 %v710_v31  ;;  %v713_v39 = vadd.f32 1.0, %v1206_v34  ;;  %v218_v11 = vadd.f32 %v1715_v24, %v217_v33  ;;  %v626_v13 = vmul.f32 1.442695, %v524_v59 }
 0x10f   :  { %v1210_v41 = vpop.eup %1209  ;;  %1227 = vrcp.f32 %v681_v35  ;;  %v680_v42 = vadd.f32 1.0, %v1208_v38  ;;  %v1071_v45 = vpop.f32.mrb[12].mxu0  ;;  %v526_v14 = vsub.f32 0.0, %v368_v60  ;;  %v378_v15 = vadd.f32 %v1715_v24, %v377_v37 }
 0x110   :  { %v1734_v46 = vpop.f32.mrb[12].mxu1  ;;  %v1212_v47 = vpop.eup %1211  ;;  %1229 = vrcp.f32 %v713_v39  ;;  %v712_v48 = vadd.f32 1.0, %v1210_v41  ;;  %v568_v17 = vmul.f32 1.442695, %v495_v63  ;;  %v497_v18 = vsub.f32 0.0, %v223_v0 }
 0x111   :  { %v1737_v51 = vpop.f32.mrb[13].mxu0  ;;  %v1739_v52 = vpop.f32.mrb[13].mxu1  ;;  %1231 = vrcp.f32 %v680_v42  ;;  %v683_v54 = vadd.f32 1.0, %v1212_v47  ;;  %v233_v19 = vadd.f32 %v1071_v45, %v1715_v24  ;;  %v632_v23 = vmul.f32 1.442695, %v527_v4 }
 0x112   :  { %v1214_v53 = vpop.eup %1213  ;;  %1233 = vrcp.f32 %v712_v48  ;;  %v529_v25 = vsub.f32 0.0, %v383_v5  ;;  %v566_v28 = vmul.f32 1.442695, %v494_v10  ;;  %v496_v29 = vsub.f32 0.0, %v218_v11 }
 0x113   :  { %v1216_v57 = vpop.eup %1215  ;;  %v715_v58 = vadd.f32 1.0, %v1214_v53  ;;  %1235 = vrcp.f32 %v683_v54  ;;  %v1744_v1 = vpop.f32.mrb[14].mxu0  ;;  %v630_v32 = vmul.f32 1.442695, %v526_v14  ;;  %v528_v33 = vsub.f32 0.0, %v378_v15 }
 0x114   :  { %v1218_v61 = vpop.eup %1217  ;;  %v682_v62 = vadd.f32 1.0, %v1216_v57  ;;  %v1746_v2 = vpop.f32.mrb[14].mxu1  ;;  %v572_v35 = vmul.f32 1.442695, %v497_v18  ;;  %v499_v36 = vsub.f32 0.0, %v233_v19  ;;  %v393_v60 = vadd.f32 %v1734_v46, %v1715_v24 }
 0x115   :  { %1237 = vrcp.f32 %v715_v58  ;;  %v714_v3 = vadd.f32 1.0, %v1218_v61  ;;  %v1749_v6 = vpop.f32.mrb[15].mxu0  ;;  %v1751_v7 = vpop.f32.mrb[15].mxu1  ;;  %v636_v40 = vmul.f32 1.442695, %v529_v25  ;;  %v228_v63 = vadd.f32 %v1715_v24, %v1737_v51 }
 0x116   :  { %v1220_v8 = vpop.eup %1219  ;;  %1239 = vrcp.f32 %v682_v62  ;;  %v570_v44 = vmul.f32 1.442695, %v496_v29  ;;  %v634_v47 = vmul.f32 1.442695, %v528_v33  ;;  %v388_v46 = vadd.f32 %v1715_v24, %v1739_v52 }
 0x117   :  { %v1222_v12 = vpop.eup %1221  ;;  %871 = vst [vmem:[%s2092_s3 + $0x8] sm:$0xff] %v1220_v8  ;;  %1241 = vrcp.f32 %v714_v3  ;;  %v1762_v20 = vpop.f32.mrb[16].mxu0  ;;  %v243_v52 = vadd.f32 %v1744_v1, %v1715_v24 }
 0x118   :  { %v1224_v16 = vpop.eup %1223  ;;  %903 = vst [vmem:[%s2092_s3 + $0x108] sm:$0xff] %v1222_v12  ;;  %1243 = vpow2.f32 %v564_v49  ;;  %v1764_v21 = vpop.f32.mrb[16].mxu1  ;;  %v576_v49 = vmul.f32 1.442695, %v499_v36  ;;  %v530_v29 = vsub.f32 0.0, %v388_v46 }
 0x119   :  { %v1226_v22 = vpop.eup %1225  ;;  %870 = vst [vmem:[%s2092_s3] sm:$0xff] %v1224_v16  ;;  %1245 = vpow2.f32 %v628_v55  ;;  %v1769_v26 = vpop.f32.mrb[17].mxu0  ;;  %v498_v16 = vsub.f32 0.0, %v228_v63 }
 0x11a   :  { %v1228_v27 = vpop.eup %1227  ;;  %902 = vst [vmem:[%s2092_s3 + $0x100] sm:$0xff] %v1226_v22  ;;  %1247 = vpow2.f32 %v562_v9  ;;  %v1774_v30 = vpop.f32.mrb[17].mxu1  ;;  %v638_v63 = vmul.f32 1.442695, %v530_v29 }
 0x11b   :  { %v1230_v31 = vpop.eup %1229  ;;  %873 = vst [vmem:[%s2092_s3 + $0x18] sm:$0xff] %v1228_v27  ;;  %1249 = vpow2.f32 %v626_v13  ;;  %v1782_v37 = vpop.f32.mrb[18].mxu0  ;;  %v531_v13 = vsub.f32 0.0, %v393_v60 }
 0x11c   :  { %v1232_v34 = vpop.eup %1231  ;;  %905 = vst [vmem:[%s2092_s3 + $0x118] sm:$0xff] %v1230_v31  ;;  %1251 = vpow2.f32 %v568_v17  ;;  %v1784_v38 = vpop.f32.mrb[18].mxu1  ;;  %v403_v31 = vadd.f32 %v1746_v2, %v1715_v24  ;;  %v501_v2 = vsub.f32 0.0, %v243_v52 }
 0x11d   :  { %v1234_v39 = vpop.eup %1233  ;;  %872 = vst [vmem:[%s2092_s3 + $0x10] sm:$0xff] %v1232_v34  ;;  %1253 = vpow2.f32 %v632_v23  ;;  %v1789_v41 = vpop.f32.mrb[19].mxu0  ;;  %v640_v34 = vmul.f32 1.442695, %v531_v13 }
 0x11e   :  { %v1791_v42 = vpop.f32.mrb[19].mxu1  ;;  %v1236_v43 = vpop.eup %1235  ;;  %904 = vst [vmem:[%s2092_s3 + $0x110] sm:$0xff] %v1234_v39  ;;  %1255 = vpow2.f32 %v566_v28  ;;  %v574_v39 = vmul.f32 1.442695, %v498_v16  ;;  %v423_v16 = vadd.f32 %v1784_v38, %v1715_v24 }
 0x11f   :  { %v1238_v45 = vpop.eup %1237  ;;  %875 = vst [vmem:[%s2092_s3 + $0x28] sm:$0xff] %v1236_v43  ;;  %1257 = vpow2.f32 %v630_v32  ;;  %v1802_v50 = vpop.f32.mrb[20].mxu0 }
 0x120   :  { %v1240_v48 = vpop.eup %1239  ;;  %907 = vst [vmem:[%s2092_s3 + $0x128] sm:$0xff] %v1238_v45  ;;  %1259 = vpow2.f32 %v572_v35  ;;  %v1807_v54 = vpop.f32.mrb[20].mxu1  ;;  %v238_v35 = vadd.f32 %v1715_v24, %v1749_v6 }
 0x121   :  { %v1242_v53 = vpop.eup %1241  ;;  %874 = vst [vmem:[%s2092_s3 + $0x20] sm:$0xff] %v1240_v48  ;;  %1261 = vpow2.f32 %v636_v40  ;;  %v1809_v55 = vpop.f32.mrb[21].mxu0  ;;  %v398_v40 = vadd.f32 %v1715_v24, %v1751_v7  ;;  %v413_v7 = vadd.f32 %v1764_v21, %v1715_v24  ;;  %v408_v21 = vadd.f32 %v1715_v24, %v1774_v30 }
 0x122   :  { %v1244_v56 = vpop.eup %1243  ;;  %906 = vst [vmem:[%s2092_s3 + $0x120] sm:$0xff] %v1242_v53  ;;  %1263 = vpow2.f32 %v570_v44  ;;  %v1814_v57 = vpop.f32.mrb[21].mxu1 }
 0x123   :  { %v1246_v58 = vpop.eup %1245  ;;  %v685_v59 = vadd.f32 1.0, %v1244_v56  ;;  %1265 = vpow2.f32 %v634_v47  ;;  %v1820_v0 = vpop.f32.mrb[22].mxu0  ;;  %v253_v47 = vadd.f32 %v1762_v20, %v1715_v24  ;;  %v533_v56 = vsub.f32 0.0, %v403_v31 }
 0x124   :  { %v1248_v61 = vpop.eup %1247  ;;  %v717_v62 = vadd.f32 1.0, %v1246_v58  ;;  %1267 = vpow2.f32 %v576_v49  ;;  %v1822_v3 = vpop.f32.mrb[22].mxu1  ;;  %v248_v20 = vadd.f32 %v1715_v24, %v1769_v26  ;;  %v580_v26 = vmul.f32 1.442695, %v501_v2 }
 0x125   :  { %v1250_v4 = vpop.eup %1249  ;;  %1269 = vrcp.f32 %v685_v59  ;;  %v684_v5 = vadd.f32 1.0, %v1248_v61  ;;  %v1824_v8 = vpop.f32.mrb[23].mxu0  ;;  %v500_v61 = vsub.f32 0.0, %v238_v35  ;;  %v503_v46 = vsub.f32 0.0, %v253_v47 }
 0x126   :  { %v1252_v9 = vpop.eup %1251  ;;  %1271 = vrcp.f32 %v717_v62  ;;  %v716_v10 = vadd.f32 1.0, %v1250_v4  ;;  %v1828_v11 = vpop.f32.mrb[23].mxu1  ;;  %v532_v4 = vsub.f32 0.0, %v398_v40 }
 0x127   :  { %v1254_v12 = vpop.eup %1253  ;;  %1273 = vrcp.f32 %v684_v5  ;;  %v687_v51 = vadd.f32 1.0, %v1252_v9  ;;  %v1830_v17 = vpop.f32.mrb[24].mxu0 }
 0x128   :  { %v1256_v14 = vpop.eup %1255  ;;  %1275 = vrcp.f32 %v716_v10  ;;  %v719_v15 = vadd.f32 1.0, %v1254_v12  ;;  %v1832_v18 = vpop.f32.mrb[24].mxu1  ;;  %v263_v12 = vadd.f32 %v1782_v37, %v1715_v24  ;;  %v578_v37 = vmul.f32 1.442695, %v500_v61 }
 0x129   :  { %v1258_v19 = vpop.eup %1257  ;;  %1277 = vrcp.f32 %v687_v51  ;;  %v686_v22 = vadd.f32 1.0, %v1256_v14  ;;  %v1836_v23 = vpop.f32.mrb[25].mxu0  ;;  %v644_v14 = vmul.f32 1.442695, %v533_v56 }
 0x12a   :  { %v1838_v25 = vpop.f32.mrb[25].mxu1  ;;  %v1260_v27 = vpop.eup %1259  ;;  %1279 = vrcp.f32 %v719_v15  ;;  %v718_v28 = vadd.f32 1.0, %v1258_v19  ;;  %v535_v15 = vsub.f32 0.0, %v413_v7 }
 0x12b   :  { %v1262_v32 = vpop.eup %1261  ;;  %1281 = vrcp.f32 %v686_v22  ;;  %v689_v33 = vadd.f32 1.0, %v1260_v27  ;;  %v1846_v43 = vpop.f32.mrb[26].mxu0  ;;  %v502_v22 = vsub.f32 0.0, %v248_v20  ;;  %v642_v27 = vmul.f32 1.442695, %v532_v4 }
 0x12c   :  { %v1264_v36 = vpop.eup %1263  ;;  %1283 = vrcp.f32 %v718_v28  ;;  %v721_v1 = vadd.f32 1.0, %v1262_v32  ;;  %v1850_v48 = vpop.f32.mrb[26].mxu1  ;;  %v534_v28 = vsub.f32 0.0, %v408_v21  ;;  %v584_v32 = vmul.f32 1.442695, %v503_v46 }
 0x12d   :  { %v1266_v44 = vpop.eup %1265  ;;  %1285 = vrcp.f32 %v689_v33  ;;  %v688_v45 = vadd.f32 1.0, %v1264_v36  ;;  %v1852_v49 = vpop.f32.mrb[27].mxu0  ;;  %v505_v33 = vsub.f32 0.0, %v263_v12  ;;  %v418_v12 = vadd.f32 %v1715_v24, %v1791_v42 }
 0x12e   :  { %v1268_v6 = vpop.eup %1267  ;;  %1287 = vrcp.f32 %v721_v1  ;;  %v720_v53 = vadd.f32 1.0, %v1266_v44  ;;  %v1856_v58 = vpop.f32.mrb[27].mxu1  ;;  %v648_v1 = vmul.f32 1.442695, %v535_v15  ;;  %v582_v44 = vmul.f32 1.442695, %v502_v22 }
 0x12f   :  { %v1270_v59 = vpop.eup %1269  ;;  %1289 = vrcp.f32 %v688_v45  ;;  %v691_v60 = vadd.f32 1.0, %v1268_v6  ;;  %v1865_v5 = vpop.f32.mrb[28].mxu0  ;;  %v646_v2 = vmul.f32 1.442695, %v534_v28  ;;  %v588_v6 = vmul.f32 1.442695, %v505_v33 }
 0x130   :  { %v1272_v62 = vpop.eup %1271  ;;  %877 = vst [vmem:[%s2092_s3 + $0x38] sm:$0xff] %v1270_v59  ;;  %1291 = vrcp.f32 %v720_v53  ;;  %v1867_v9 = vpop.f32.mrb[28].mxu1 }
 0x131   :  { %v1274_v10 = vpop.eup %1273  ;;  %909 = vst [vmem:[%s2092_s3 + $0x138] sm:$0xff] %v1272_v62  ;;  %1293 = vrcp.f32 %v691_v60  ;;  %v1874_v51 = vpop.f32.mrb[29].mxu0  ;;  %v258_v60 = vadd.f32 %v1715_v24, %v1789_v41  ;;  %v273_v41 = vadd.f32 %v1802_v50, %v1715_v24 }
 0x132   :  { %v1876_v13 = vpop.f32.mrb[29].mxu1  ;;  %v1276_v30 = vpop.eup %1275  ;;  %876 = vst [vmem:[%s2092_s3 + $0x30] sm:$0xff] %v1274_v10  ;;  %1295 = vpow2.f32 %v640_v34 }
 0x133   :  { %v1278_v19 = vpop.eup %1277  ;;  %908 = vst [vmem:[%s2092_s3 + $0x130] sm:$0xff] %v1276_v30  ;;  %1297 = vpow2.f32 %v574_v39  ;;  %v1889_v29 = vpop.f32.mrb[30].mxu0  ;;  %v537_v39 = vsub.f32 0.0, %v423_v16  ;;  %v504_v46 = vsub.f32 0.0, %v258_v60  ;;  %v507_v33 = vsub.f32 0.0, %v273_v41 }
 0x134   :  { %v1280_v52 = vpop.eup %1279  ;;  %879 = vst [vmem:[%s2092_s3 + $0x48] sm:$0xff] %v1278_v19  ;;  %1299 = vpow2.f32 %v638_v63  ;;  %v1891_v31 = vpop.f32.mrb[30].mxu1  ;;  %v433_v19 = vadd.f32 %v1807_v54, %v1715_v24 }
 0x135   :  { %v1282_v38 = vpop.eup %1281  ;;  %911 = vst [vmem:[%s2092_s3 + $0x148] sm:$0xff] %v1280_v52  ;;  %1301 = vpow2.f32 %v580_v26  ;;  %v1896_v34 = vpop.f32.mrb[31].mxu0  ;;  %v652_v56 = vmul.f32 1.442695, %v537_v39  ;;  %v268_v52 = vadd.f32 %v1715_v24, %v1809_v55  ;;  %v586_v28 = vmul.f32 1.442695, %v504_v46 }
 0x136   :  { %v1898_v35 = vpop.f32.mrb[31].mxu1  ;;  %v1284_v36 = vpop.eup %1283  ;;  %878 = vst [vmem:[%s2092_s3 + $0x40] sm:$0xff] %v1282_v38  ;;  %1303 = vpow2.f32 %v644_v14  ;;  %v536_v38 = vsub.f32 0.0, %v418_v12  ;;  %v539_v39 = vsub.f32 0.0, %v433_v19 }
 0x137   :  { %v1286_v40 = vpop.eup %1285  ;;  %910 = vst [vmem:[%s2092_s3 + $0x140] sm:$0xff] %v1284_v36  ;;  %1305 = vpow2.f32 %v578_v37  ;;  %v428_v36 = vadd.f32 %v1715_v24, %v1814_v57  ;;  %v278_v57 = vadd.f32 %v1715_v24, %v1824_v8 }
 0x138   :  { %v1288_v45 = vpop.eup %1287  ;;  %881 = vst [vmem:[%s2092_s3 + $0x58] sm:$0xff] %v1286_v40  ;;  %1307 = vpow2.f32 %v642_v27  ;;  %v283_v40 = vadd.f32 %v1820_v0, %v1715_v24  ;;  %v438_v0 = vadd.f32 %v1715_v24, %v1828_v11  ;;  %v656_v8 = vmul.f32 1.442695, %v539_v39 }
 0x139   :  { %v1290_v47 = vpop.eup %1289  ;;  %913 = vst [vmem:[%s2092_s3 + $0x158] sm:$0xff] %v1288_v45  ;;  %1309 = vpow2.f32 %v584_v32  ;;  %v506_v45 = vsub.f32 0.0, %v268_v52  ;;  %v453_v11 = vadd.f32 %v1832_v18, %v1715_v24 }
 0x13a   :  { %v1292_v53 = vpop.eup %1291  ;;  %880 = vst [vmem:[%s2092_s3 + $0x50] sm:$0xff] %v1290_v47  ;;  %1311 = vpow2.f32 %v648_v1  ;;  %v540_v12 = vsub.f32 0.0, %v438_v0 }
 0x13b   :  { %v1294_v7 = vpop.eup %1293  ;;  %912 = vst [vmem:[%s2092_s3 + $0x150] sm:$0xff] %v1292_v53  ;;  %1313 = vpow2.f32 %v582_v44  ;;  %v650_v53 = vmul.f32 1.442695, %v536_v38 }
 0x13c   :  { %v1296_v59 = vpop.eup %1295  ;;  %883 = vst [vmem:[%s2092_s3 + $0x68] sm:$0xff] %v1294_v7  ;;  %1315 = vpow2.f32 %v646_v2  ;;  %v443_v2 = vadd.f32 %v1822_v3, %v1715_v24  ;;  %v592_v3 = vmul.f32 1.442695, %v507_v33  ;;  %v658_v52 = vmul.f32 1.442695, %v540_v12 }
 0x13d   :  { %v1298_v61 = vpop.eup %1297  ;;  %v723_v20 = vadd.f32 1.0, %v1296_v59  ;;  %1317 = vpow2.f32 %v588_v6  ;;  %v538_v59 = vsub.f32 0.0, %v428_v36 }
 0x13e   :  { %v1300_v62 = vpop.eup %1299  ;;  %v690_v63 = vadd.f32 1.0, %v1298_v61  ;;  %1319 = vpow2.f32 %v652_v56  ;;  %v509_v61 = vsub.f32 0.0, %v283_v40  ;;  %v303_v40 = vadd.f32 %v1846_v43, %v1715_v24 }
 0x13f   :  { %v1302_v4 = vpop.eup %1301  ;;  %1321 = vrcp.f32 %v723_v20  ;;  %v722_v21 = vadd.f32 1.0, %v1300_v62  ;;  %v293_v20 = vadd.f32 %v1830_v17, %v1715_v24  ;;  %v288_v17 = vadd.f32 %v1715_v24, %v1836_v23 }
 0x140   :  { %v1304_v10 = vpop.eup %1303  ;;  %1323 = vrcp.f32 %v690_v63  ;;  %v693_v26 = vadd.f32 1.0, %v1302_v4  ;;  %v541_v63 = vsub.f32 0.0, %v443_v2  ;;  %v654_v46 = vmul.f32 1.442695, %v538_v59 }
 0x141   :  { %v1306_v30 = vpop.eup %1305  ;;  %1325 = vrcp.f32 %v722_v21  ;;  %v725_v14 = vadd.f32 1.0, %v1304_v10  ;;  %v590_v21 = vmul.f32 1.442695, %v506_v45  ;;  %v508_v10 = vsub.f32 0.0, %v278_v57 }
 0x142   :  { %v1308_v15 = vpop.eup %1307  ;;  %1327 = vrcp.f32 %v693_v26  ;;  %v692_v16 = vadd.f32 1.0, %v1306_v30  ;;  %v596_v30 = vmul.f32 1.442695, %v509_v61  ;;  %v660_v23 = vmul.f32 1.442695, %v541_v63 }
 0x143   :  { %v1310_v37 = vpop.eup %1309  ;;  %1329 = vrcp.f32 %v725_v14  ;;  %v724_v22 = vadd.f32 1.0, %v1308_v15  ;;  %v511_v14 = vsub.f32 0.0, %v293_v20  ;;  %v543_v15 = vsub.f32 0.0, %v453_v11 }
 0x144   :  { %v1312_v27 = vpop.eup %1311  ;;  %1331 = vrcp.f32 %v692_v16  ;;  %v695_v42 = vadd.f32 1.0, %v1310_v37  ;;  %v594_v19 = vmul.f32 1.442695, %v508_v10  ;;  %v510_v37 = vsub.f32 0.0, %v288_v17 }
 0x145   :  { %v1314_v32 = vpop.eup %1313  ;;  %1333 = vrcp.f32 %v724_v22  ;;  %v727_v50 = vadd.f32 1.0, %v1312_v27  ;;  %v664_v38 = vmul.f32 1.442695, %v543_v15  ;;  %v463_v43 = vadd.f32 %v1850_v48, %v1715_v24 }
 0x146   :  { %v1316_v1 = vpop.eup %1315  ;;  %1335 = vrcp.f32 %v695_v42  ;;  %v694_v54 = vadd.f32 1.0, %v1314_v32  ;;  %v600_v42 = vmul.f32 1.442695, %v511_v14  ;;  %v313_v48 = vadd.f32 %v1865_v5, %v1715_v24 }
 0x147   :  { %v1318_v55 = vpop.eup %1317  ;;  %1337 = vrcp.f32 %v727_v50  ;;  %v726_v44 = vadd.f32 1.0, %v1316_v1  ;;  %v598_v50 = vmul.f32 1.442695, %v510_v37  ;;  %v448_v1 = vadd.f32 %v1715_v24, %v1838_v25 }
 0x148   :  { %v1320_v47 = vpop.eup %1319  ;;  %1339 = vrcp.f32 %v694_v54  ;;  %v697_v6 = vadd.f32 1.0, %v1318_v55  ;;  %v513_v25 = vsub.f32 0.0, %v303_v40  ;;  %v545_v17 = vsub.f32 0.0, %v463_v43 }
 0x149   :  { %v1322_v56 = vpop.eup %1321  ;;  %1341 = vrcp.f32 %v726_v44  ;;  %v729_v7 = vadd.f32 1.0, %v1320_v47  ;;  %v468_v5 = vadd.f32 %v1715_v24, %v1876_v13  ;;  %v515_v15 = vsub.f32 0.0, %v313_v48 }
 0x14a   :  { %v1324_v60 = vpop.eup %1323  ;;  %915 = vst [vmem:[%s2092_s3 + $0x168] sm:$0xff] %v1322_v56  ;;  %1343 = vrcp.f32 %v697_v6 }
 0x14b   :  { %v1326_v62 = vpop.eup %1325  ;;  %882 = vst [vmem:[%s2092_s3 + $0x60] sm:$0xff] %v1324_v60  ;;  %1345 = vrcp.f32 %v729_v7 }
 0x14c   :  { %v1328_v4 = vpop.eup %1327  ;;  %914 = vst [vmem:[%s2092_s3 + $0x160] sm:$0xff] %v1326_v62  ;;  %1347 = vpow2.f32 %v586_v28 }
 0x14d   :  { %v1330_v26 = vpop.eup %1329  ;;  %885 = vst [vmem:[%s2092_s3 + $0x78] sm:$0xff] %v1328_v4  ;;  %1349 = vpow2.f32 %v650_v53  ;;  %v542_v53 = vsub.f32 0.0, %v448_v1  ;;  %v604_v4 = vmul.f32 1.442695, %v513_v25 }
 0x14e   :  { %v1332_v18 = vpop.eup %1331  ;;  %917 = vst [vmem:[%s2092_s3 + $0x178] sm:$0xff] %v1330_v26  ;;  %1351 = vpow2.f32 %v592_v3  ;;  %v298_v3 = vadd.f32 %v1715_v24, %v1852_v49  ;;  %v473_v49 = vadd.f32 %v1867_v9, %v1715_v24  ;;  %v1451_v9 = vld [vmem:[%s2091_s2] ss:$0 sm:$0xff] }
 0x14f   :  { %v1334_v41 = vpop.eup %1333  ;;  %884 = vst [vmem:[%s2092_s3 + $0x70] sm:$0xff] %v1332_v18  ;;  %1353 = vpow2.f32 %v656_v8  ;;  %v662_v62 = vmul.f32 1.442695, %v542_v53  ;;  %v458_v8 = vadd.f32 %v1715_v24, %v1856_v58  ;;  %v308_v58 = vadd.f32 %v1715_v24, %v1874_v51 }
 0x150   :  { %v1336_v16 = vpop.eup %1335  ;;  %916 = vst [vmem:[%s2092_s3 + $0x170] sm:$0xff] %v1334_v41  ;;  %1355 = vpow2.f32 %v590_v21  ;;  %v512_v12 = vsub.f32 0.0, %v298_v3  ;;  %v668_v51 = vmul.f32 1.442695, %v545_v17  ;;  %v547_v37 = vsub.f32 0.0, %v473_v49 }
 0x151   :  { %v1338_v22 = vpop.eup %1337  ;;  %887 = vst [vmem:[%s2092_s3 + $0x88] sm:$0xff] %v1336_v16  ;;  %1357 = vpow2.f32 %v654_v46  ;;  %v544_v14 = vsub.f32 0.0, %v458_v8  ;;  %v323_v16 = vadd.f32 %v1451_v9, %v1889_v29  ;;  %v483_v24 = vadd.f32 %v1451_v9, %v1891_v31 }
 0x152   :  { %v1340_v27 = vpop.eup %1339  ;;  %919 = vst [vmem:[%s2092_s3 + $0x188] sm:$0xff] %v1338_v22  ;;  %1359 = vpow2.f32 %v596_v30  ;;  %v602_v22 = vmul.f32 1.442695, %v512_v12  ;;  %v318_v29 = vadd.f32 %v1451_v9, %v1896_v34  ;;  %v478_v31 = vadd.f32 %v1451_v9, %v1898_v35 }
 0x153   :  { %v1342_v28 = vpop.eup %1341  ;;  %886 = vst [vmem:[%s2092_s3 + $0x80] sm:$0xff] %v1340_v27  ;;  %1361 = vpow2.f32 %v660_v23  ;;  %v672_v34 = vmul.f32 1.442695, %v547_v37 }
 0x154   :  { %v1344_v32 = vpop.eup %1343  ;;  %918 = vst [vmem:[%s2092_s3 + $0x180] sm:$0xff] %v1342_v28  ;;  %1363 = vpow2.f32 %v594_v19  ;;  %v546_v28 = vsub.f32 0.0, %v468_v5 }
 0x155   :  { %v1346_v33 = vpop.eup %1345  ;;  %889 = vst [vmem:[%s2092_s3 + $0x98] sm:$0xff] %v1344_v32  ;;  %1365 = vpow2.f32 %v658_v52  ;;  %v514_v52 = vsub.f32 0.0, %v308_v58  ;;  %v608_v32 = vmul.f32 1.442695, %v515_v15 }
 0x156   :  { %v1348_v36 = vpop.eup %1347  ;;  %921 = vst [vmem:[%s2092_s3 + $0x198] sm:$0xff] %v1346_v33  ;;  %1367 = vpow2.f32 %v600_v42  ;;  %v666_v42 = vmul.f32 1.442695, %v544_v14  ;;  %v670_v40 = vmul.f32 1.442695, %v546_v28 }
 0x157   :  { %v1350_v54 = vpop.eup %1349  ;;  %v696_v39 = vadd.f32 1.0, %v1348_v36  ;;  %1369 = vpow2.f32 %v664_v38  ;;  %v549_v36 = vsub.f32 0.0, %v483_v24  ;;  %v606_v35 = vmul.f32 1.442695, %v514_v52 }
 0x158   :  { %v1352_v55 = vpop.eup %1351  ;;  %v728_v44 = vadd.f32 1.0, %v1350_v54  ;;  %1371 = vpow2.f32 %v598_v50  ;;  %v517_v50 = vsub.f32 0.0, %v323_v16  ;;  %v516_v54 = vsub.f32 0.0, %v318_v29 }
 0x159   :  { %v1354_v45 = vpop.eup %1353  ;;  %1373 = vrcp.f32 %v696_v39  ;;  %v699_v2 = vadd.f32 1.0, %v1352_v55  ;;  %v548_v55 = vsub.f32 0.0, %v478_v31 }
 0x15a   :  { %v1356_v47 = vpop.eup %1355  ;;  %1375 = vrcp.f32 %v728_v44  ;;  %v731_v6 = vadd.f32 1.0, %v1354_v45  ;;  %v612_v45 = vmul.f32 1.442695, %v517_v50  ;;  %v610_v53 = vmul.f32 1.442695, %v516_v54 }
 0x15b   :  { %v1358_v57 = vpop.eup %1357  ;;  %1377 = vrcp.f32 %v699_v2  ;;  %v698_v56 = vadd.f32 1.0, %v1356_v47  ;;  %v676_v47 = vmul.f32 1.442695, %v549_v36 }
 0x15c   :  { %v1360_v7 = vpop.eup %1359  ;;  %1379 = vrcp.f32 %v731_v6  ;;  %v730_v59 = vadd.f32 1.0, %v1358_v57 }
 0x15d   :  { %v1362_v0 = vpop.eup %1361  ;;  %1381 = vrcp.f32 %v698_v56  ;;  %v701_v60 = vadd.f32 1.0, %v1360_v7  ;;  %v674_v56 = vmul.f32 1.442695, %v548_v55 }
 0x15e   :  { %v1364_v61 = vpop.eup %1363  ;;  %1383 = vrcp.f32 %v730_v59  ;;  %v733_v20 = vadd.f32 1.0, %v1362_v0 }
 0x15f   :  { %v1366_v63 = vpop.eup %1365  ;;  %1385 = vrcp.f32 %v701_v60  ;;  %v700_v11 = vadd.f32 1.0, %v1364_v61 }
 0x160   :  { %v1368_v21 = vpop.eup %1367  ;;  %1387 = vrcp.f32 %v733_v20  ;;  %v732_v10 = vadd.f32 1.0, %v1366_v63 }
 0x161   :  { %v1370_v26 = vpop.eup %1369  ;;  %1389 = vrcp.f32 %v700_v11  ;;  %v703_v46 = vadd.f32 1.0, %v1368_v21 }
 0x162   :  { %v1372_v18 = vpop.eup %1371  ;;  %1391 = vrcp.f32 %v732_v10  ;;  %v735_v30 = vadd.f32 1.0, %v1370_v26 }
 0x163   :  { %v1374_v41 = vpop.eup %1373  ;;  %1393 = vrcp.f32 %v703_v46  ;;  %v702_v23 = vadd.f32 1.0, %v1372_v18 }
 0x164   :  { %v1376_v19 = vpop.eup %1375  ;;  %888 = vst [vmem:[%s2092_s3 + $0x90] sm:$0xff] %v1374_v41  ;;  %1395 = vrcp.f32 %v735_v30 }
 0x165   :  { %v1378_v13 = vpop.eup %1377  ;;  %920 = vst [vmem:[%s2092_s3 + $0x190] sm:$0xff] %v1376_v19  ;;  %1397 = vrcp.f32 %v702_v23 }
 0x166   :  { %v1380_v27 = vpop.eup %1379  ;;  %891 = vst [vmem:[%s2092_s3 + $0xa8] sm:$0xff] %v1378_v13  ;;  %1399 = vpow2.f32 %v662_v62 }
 0x167   :  { %v1382_v38 = vpop.eup %1381  ;;  %923 = vst [vmem:[%s2092_s3 + $0x1a8] sm:$0xff] %v1380_v27  ;;  %1401 = vpow2.f32 %v604_v4 }
 0x168   :  { %v1384_v33 = vpop.eup %1383  ;;  %890 = vst [vmem:[%s2092_s3 + $0xa0] sm:$0xff] %v1382_v38  ;;  %1403 = vpow2.f32 %v668_v51 }
 0x169   :  { %v1386_v1 = vpop.eup %1385  ;;  %922 = vst [vmem:[%s2092_s3 + $0x1a0] sm:$0xff] %v1384_v33  ;;  %1405 = vpow2.f32 %v602_v22 }
 0x16a   :  { %v1388_v39 = vpop.eup %1387  ;;  %893 = vst [vmem:[%s2092_s3 + $0xb8] sm:$0xff] %v1386_v1  ;;  %1407 = vpow2.f32 %v666_v42 }
 0x16b   :  { %v1390_v44 = vpop.eup %1389  ;;  %925 = vst [vmem:[%s2092_s3 + $0x1b8] sm:$0xff] %v1388_v39  ;;  %1409 = vpow2.f32 %v608_v32 }
 0x16c   :  { %v1392_v2 = vpop.eup %1391  ;;  %892 = vst [vmem:[%s2092_s3 + $0xb0] sm:$0xff] %v1390_v44  ;;  %1411 = vpow2.f32 %v672_v34 }
 0x16d   :  { %v1394_v6 = vpop.eup %1393  ;;  %924 = vst [vmem:[%s2092_s3 + $0x1b0] sm:$0xff] %v1392_v2  ;;  %1413 = vpow2.f32 %v606_v35 }
 0x16e   :  { %v1396_v57 = vpop.eup %1395  ;;  %895 = vst [vmem:[%s2092_s3 + $0xc8] sm:$0xff] %v1394_v6  ;;  %1415 = vpow2.f32 %v670_v40 }
 0x16f   :  { %v1398_v25 = vpop.eup %1397  ;;  %927 = vst [vmem:[%s2092_s3 + $0x1c8] sm:$0xff] %v1396_v57  ;;  %1417 = vpow2.f32 %v612_v45 }
 0x170   :  { %v1400_v7 = vpop.eup %1399  ;;  %894 = vst [vmem:[%s2092_s3 + $0xc0] sm:$0xff] %v1398_v25  ;;  %1419 = vpow2.f32 %v676_v47 }
 0x171   :  { %v1402_v59 = vpop.eup %1401  ;;  %v734_v43 = vadd.f32 1.0, %v1400_v7  ;;  %1421 = vpow2.f32 %v610_v53 }
 0x172   :  { %v1404_v0 = vpop.eup %1403  ;;  %v705_v60 = vadd.f32 1.0, %v1402_v59  ;;  %1423 = vpow2.f32 %v674_v56 }
 0x173   :  { %v1406_v3 = vpop.eup %1405  ;;  %1425 = vrcp.f32 %v734_v43  ;;  %v737_v61 = vadd.f32 1.0, %v1404_v0 }
 0x174   :  { %v1408_v20 = vpop.eup %1407  ;;  %1427 = vrcp.f32 %v705_v60  ;;  %v704_v62 = vadd.f32 1.0, %v1406_v3 }
 0x175   :  { %v1410_v8 = vpop.eup %1409  ;;  %1429 = vrcp.f32 %v737_v61  ;;  %v736_v63 = vadd.f32 1.0, %v1408_v20 }
 0x176   :  { %v1412_v11 = vpop.eup %1411  ;;  %1431 = vrcp.f32 %v704_v62  ;;  %v707_v4 = vadd.f32 1.0, %v1410_v8 }
 0x177   :  { %v1414_v48 = vpop.eup %1413  ;;  %1433 = vrcp.f32 %v736_v63  ;;  %v739_v21 = vadd.f32 1.0, %v1412_v11 }
 0x178   :  { %v1416_v10 = vpop.eup %1415  ;;  %1435 = vrcp.f32 %v707_v4  ;;  %v706_v17 = vadd.f32 1.0, %v1414_v48 }
 0x179   :  { %v1418_v49 = vpop.eup %1417  ;;  %1437 = vrcp.f32 %v739_v21  ;;  %v738_v26 = vadd.f32 1.0, %v1416_v10 }
 0x17a   :  { %v1420_v46 = vpop.eup %1419  ;;  %1439 = vrcp.f32 %v706_v17  ;;  %v709_v12 = vadd.f32 1.0, %v1418_v49 }
 0x17b   :  { %v1422_v58 = vpop.eup %1421  ;;  %1441 = vrcp.f32 %v738_v26  ;;  %v741_v18 = vadd.f32 1.0, %v1420_v46 }
 0x17c   :  { %v1424_v30 = vpop.eup %1423  ;;  %1443 = vrcp.f32 %v709_v12  ;;  %v708_v14 = vadd.f32 1.0, %v1422_v58 }
 0x17d   :  { %v1426_v5 = vpop.eup %1425  ;;  %1445 = vrcp.f32 %v741_v18  ;;  %v740_v41 = vadd.f32 1.0, %v1424_v30 }
 0x17e   :  { %v1428_v23 = vpop.eup %1427  ;;  %926 = vst [vmem:[%s2092_s3 + $0x1c0] sm:$0xff] %v1426_v5  ;;  %1447 = vrcp.f32 %v708_v14 }
 0x17f   :  { %v1430_v15 = vpop.eup %1429  ;;  %897 = vst [vmem:[%s2092_s3 + $0xd8] sm:$0xff] %v1428_v23  ;;  %1449 = vrcp.f32 %v740_v41 }
 0x180   :  { %v1432_v9 = vpop.eup %1431  ;;  %929 = vst [vmem:[%s2092_s3 + $0x1d8] sm:$0xff] %v1430_v15 }
 0x181   :  { %v1434_v16 = vpop.eup %1433  ;;  %896 = vst [vmem:[%s2092_s3 + $0xd0] sm:$0xff] %v1432_v9 }
 0x182   :  { %v1436_v19 = vpop.eup %1435  ;;  %928 = vst [vmem:[%s2092_s3 + $0x1d0] sm:$0xff] %v1434_v16 }
 0x183   :  { %v1438_v51 = vpop.eup %1437  ;;  %899 = vst [vmem:[%s2092_s3 + $0xe8] sm:$0xff] %v1436_v19 }
 0x184   :  { %v1440_v37 = vpop.eup %1439  ;;  %931 = vst [vmem:[%s2092_s3 + $0x1e8] sm:$0xff] %v1438_v51 }
 0x185   :  { %v1442_v24 = vpop.eup %1441  ;;  %898 = vst [vmem:[%s2092_s3 + $0xe0] sm:$0xff] %v1440_v37 }
 0x186   :  { %v1444_v13 = vpop.eup %1443  ;;  %930 = vst [vmem:[%s2092_s3 + $0x1e0] sm:$0xff] %v1442_v24 }
 0x187   :  { %v1446_v22 = vpop.eup %1445  ;;  %901 = vst [vmem:[%s2092_s3 + $0xf8] sm:$0xff] %v1444_v13 }
 0x188   :  { %v1448_v52 = vpop.eup %1447  ;;  %933 = vst [vmem:[%s2092_s3 + $0x1f8] sm:$0xff] %v1446_v22 }
 0x189   :  { %v1450_v29 = vpop.eup %1449  ;;  %900 = vst [vmem:[%s2092_s3 + $0xf0] sm:$0xff] %v1448_v52 }
 0x18a   :  { %932 = vst [vmem:[%s2092_s3 + $0x1f0] sm:$0xff] %v1450_v29 }

// kernel: lenet_forward.5
= control target key start
LH: loop header
LB: loop body
LE: loop exit
PB: predicated region body
PF: predicated region fallthrough
CT: control target
= control target key end

     0   :  { %s1218_s1 = inlined_call_operand.vmem [shape: f32[384,128], index: 1, kind: input, shape index: {}]   ;;  %s1219_s0 = inlined_call_operand.vmem [shape: f32[128,384], index: 0, kind: input, shape index: {}]   ;;  %s1220_s2 = inlined_call_operand.vmem [shape: f32[1,128], index: 2, kind: input, shape index: {}]   ;;  %s1221_s3 = inlined_call_operand.vmem [shape: f32[128,128], index: 3, kind: output, shape index: {}]  }
   0x1   :  { %v78_v0 = vld [vmem:[%s1218_s1 + $0x80] sm:$0xff]  ;;  %v79_v1 = vld [vmem:[%s1218_s1 + $0x88] sm:$0xff]  ;;  %v80_v5 = vld [vmem:[%s1218_s1 + $0x90] sm:$0xff] }
   0x2   :  { %v62_v2 = vld [vmem:[%s1218_s1] sm:$0xff]  ;;  %v692_v3 = vpack.c.bf16 %v79_v1, %v78_v0  ;;  %v63_v4 = vld [vmem:[%s1218_s1 + $0x8] sm:$0xff]  ;;  %v81_v6 = vld [vmem:[%s1218_s1 + $0x98] sm:$0xff] }
   0x3   :  { %v694_v7 = vpack.c.bf16 %v63_v4, %v62_v2  ;;  %v696_v8 = vpack.c.bf16 %v81_v6, %v80_v5  ;;  %v94_v9 = vld [vmem:[%s1218_s1 + $0x100] sm:$0xff]  ;;  %v95_v10 = vld [vmem:[%s1218_s1 + $0x108] sm:$0xff]  ;;  %v64_v11 = vld [vmem:[%s1218_s1 + $0x10] sm:$0xff] }
   0x4   :  { %693 = vmatprep.subr.bf16.mxu0 %v692_v3  ;;  %v724_v12 = vpack.c.bf16 %v95_v10, %v94_v9  ;;  %v65_v13 = vld [vmem:[%s1218_s1 + $0x18] sm:$0xff]  ;;  %v82_v14 = vld [vmem:[%s1218_s1 + $0xa0] sm:$0xff]  ;;  %v83_v15 = vld [vmem:[%s1218_s1 + $0xa8] sm:$0xff] }
   0x5   :  { %695 = vmatpush3.bf16.msra.mxu0 %v694_v7  ;;  %v698_v16 = vpack.c.bf16 %v65_v13, %v64_v11  ;;  %v96_v17 = vld [vmem:[%s1218_s1 + $0x110] sm:$0xff]  ;;  %v97_v18 = vld [vmem:[%s1218_s1 + $0x118] sm:$0xff]  ;;  %v700_v19 = vpack.c.bf16 %v83_v15, %v82_v14  ;;  %v66_v21 = vld [vmem:[%s1218_s1 + $0x20] sm:$0xff] }
   0x6   :  { %697 = vmatprep.subr.bf16.mxu0 %v696_v8  ;;  %725 = vmatprep.subr.bf16.mxu1 %v724_v12  ;;  %v728_v20 = vpack.c.bf16 %v97_v18, %v96_v17  ;;  %v67_v22 = vld [vmem:[%s1218_s1 + $0x28] sm:$0xff]  ;;  %v84_v23 = vld [vmem:[%s1218_s1 + $0xb0] sm:$0xff]  ;;  %v85_v24 = vld [vmem:[%s1218_s1 + $0xb8] sm:$0xff] }
   0x7   :  { %727 = vmatpush3.bf16.msra.mxu1 %v724_v12  ;;  %v98_v25 = vld [vmem:[%s1218_s1 + $0x120] sm:$0xff]  ;;  %v99_v26 = vld [vmem:[%s1218_s1 + $0x128] sm:$0xff]  ;;  %v702_v28 = vpack.c.bf16 %v67_v22, %v66_v21  ;;  %v100_v29 = vld [vmem:[%s1218_s1 + $0x130] sm:$0xff]  ;;  %v704_v31 = vpack.c.bf16 %v85_v24, %v84_v23 }
   0x8   :  { %729 = vmatprep.subr.bf16.mxu1 %v728_v20  ;;  %v732_v27 = vpack.c.bf16 %v99_v26, %v98_v25  ;;  %v101_v30 = vld [vmem:[%s1218_s1 + $0x138] sm:$0xff]  ;;  %v68_v32 = vld [vmem:[%s1218_s1 + $0x30] sm:$0xff]  ;;  %v86_v34 = vld [vmem:[%s1218_s1 + $0xc0] sm:$0xff] }
   0x9   :  { %699 = vmatpush3.bf16.msra.mxu0 %v698_v16  ;;  %v69_v33 = vld [vmem:[%s1218_s1 + $0x38] sm:$0xff]  ;;  %v87_v35 = vld [vmem:[%s1218_s1 + $0xc8] sm:$0xff]  ;;  %v736_v36 = vpack.c.bf16 %v101_v30, %v100_v29  ;;  %v102_v38 = vld [vmem:[%s1218_s1 + $0x140] sm:$0xff] }
   0xa   :  { %701 = vmatprep.subr.bf16.mxu0 %v700_v19  ;;  %v706_v37 = vpack.c.bf16 %v69_v33, %v68_v32  ;;  %v103_v39 = vld [vmem:[%s1218_s1 + $0x148] sm:$0xff]  ;;  %v708_v40 = vpack.c.bf16 %v87_v35, %v86_v34  ;;  %v70_v41 = vld [vmem:[%s1218_s1 + $0x40] sm:$0xff]  ;;  %v88_v43 = vld [vmem:[%s1218_s1 + $0xd0] sm:$0xff] }
   0xb   :  { %731 = vmatpush3.bf16.msra.mxu1 %v728_v20  ;;  %v71_v42 = vld [vmem:[%s1218_s1 + $0x48] sm:$0xff]  ;;  %v89_v44 = vld [vmem:[%s1218_s1 + $0xd8] sm:$0xff]  ;;  %v740_v45 = vpack.c.bf16 %v103_v39, %v102_v38  ;;  %v104_v48 = vld [vmem:[%s1218_s1 + $0x150] sm:$0xff] }
   0xc   :  { %733 = vmatprep.subr.bf16.mxu1 %v732_v27  ;;  %v15_v46 = vld [vmem:[%s1219_s0 + $0x8] sm:$0xff]  ;;  %v710_v47 = vpack.c.bf16 %v71_v42, %v70_v41  ;;  %v105_v49 = vld [vmem:[%s1218_s1 + $0x158] sm:$0xff]  ;;  %v712_v50 = vpack.c.bf16 %v89_v44, %v88_v43  ;;  %v72_v51 = vld [vmem:[%s1218_s1 + $0x50] sm:$0xff] }
   0xd   :  { %703 = vmatpush3.bf16.msra.mxu0 %v702_v28  ;;  %181 = vmatprep.mubr.f32.mxu0 %v15_v46  ;;  %v73_v52 = vld [vmem:[%s1218_s1 + $0x58] sm:$0xff]  ;;  %v16_v53 = vld [vmem:[%s1219_s0 + $0x10] sm:$0xff]  ;;  %v90_v54 = vld [vmem:[%s1218_s1 + $0xe0] sm:$0xff]  ;;  %v744_v56 = vpack.c.bf16 %v105_v49, %v104_v48 }
   0xe   :  { %705 = vmatprep.subr.bf16.mxu0 %v704_v31  ;;  %v91_v55 = vld [vmem:[%s1218_s1 + $0xe8] sm:$0xff]  ;;  %668 = vmatprep.mubr.f32.mxu1 %v16_v53  ;;  %v714_v57 = vpack.c.bf16 %v73_v52, %v72_v51  ;;  %v106_v58 = vld [vmem:[%s1218_s1 + $0x160] sm:$0xff]  ;;  %v92_v63 = vld [vmem:[%s1218_s1 + $0xf0] sm:$0xff] }
   0xf   :  { %735 = vmatpush3.bf16.msra.mxu1 %v732_v27  ;;  %v107_v59 = vld [vmem:[%s1218_s1 + $0x168] sm:$0xff]  ;;  %v716_v60 = vpack.c.bf16 %v91_v55, %v90_v54  ;;  %v74_v61 = vld [vmem:[%s1218_s1 + $0x60] sm:$0xff]  ;;  %v93_v0 = vld [vmem:[%s1218_s1 + $0xf8] sm:$0xff] }
  0x10   :  { %737 = vmatprep.subr.bf16.mxu1 %v736_v36  ;;  %v75_v62 = vld [vmem:[%s1218_s1 + $0x68] sm:$0xff]  ;;  %v748_v1 = vpack.c.bf16 %v107_v59, %v106_v58  ;;  %v108_v3 = vld [vmem:[%s1218_s1 + $0x170] sm:$0xff]  ;;  %v109_v4 = vld [vmem:[%s1218_s1 + $0x178] sm:$0xff]  ;;  %v720_v5 = vpack.c.bf16 %v93_v0, %v92_v63 }
  0x11   :  { %707 = vmatpush3.bf16.msra.mxu0 %v706_v37  ;;  %v718_v2 = vpack.c.bf16 %v75_v62, %v74_v61  ;;  %v76_v6 = vld [vmem:[%s1218_s1 + $0x70] sm:$0xff]  ;;  %v77_v7 = vld [vmem:[%s1218_s1 + $0x78] sm:$0xff]  ;;  %v752_v8 = vpack.c.bf16 %v109_v4, %v108_v3  ;;  %v14_v10 = vld [vmem:[%s1219_s0] sm:$0xff] }
  0x12   :  { %709 = vmatprep.subr.bf16.mxu0 %v708_v40  ;;  %v722_v9 = vpack.c.bf16 %v77_v7, %v76_v6  ;;  %v18_v11 = vld [vmem:[%s1219_s0 + $0x20] sm:$0xff]  ;;  %v19_v12 = vld [vmem:[%s1219_s0 + $0x28] sm:$0xff]  ;;  %v17_v14 = vld [vmem:[%s1219_s0 + $0x18] sm:$0xff] }
  0x13   :  { %739 = vmatpush3.bf16.msra.mxu1 %v736_v36  ;;  %v22_v13 = vld [vmem:[%s1219_s0 + $0x40] sm:$0xff]  ;;  %v21_v15 = vld [vmem:[%s1219_s0 + $0x38] sm:$0xff]  ;;  %v28_v17 = vld [vmem:[%s1219_s0 + $0x70] sm:$0xff] }
  0x14   :  { %741 = vmatprep.subr.bf16.mxu1 %v740_v45  ;;  %v25_v16 = vld [vmem:[%s1219_s0 + $0x58] sm:$0xff]  ;;  %v20_v18 = vld [vmem:[%s1219_s0 + $0x30] sm:$0xff]  ;;  %v31_v20 = vld [vmem:[%s1219_s0 + $0x88] sm:$0xff] }
  0x15   :  { %711 = vmatpush3.bf16.msra.mxu0 %v710_v47  ;;  %v24_v19 = vld [vmem:[%s1219_s0 + $0x50] sm:$0xff]  ;;  %v34_v21 = vld [vmem:[%s1219_s0 + $0xa0] sm:$0xff]  ;;  %v23_v22 = vld [vmem:[%s1219_s0 + $0x48] sm:$0xff] }
  0x16   :  { %713 = vmatprep.subr.bf16.mxu0 %v712_v50  ;;  %v27_v23 = vld [vmem:[%s1219_s0 + $0x68] sm:$0xff]  ;;  %v37_v24 = vld [vmem:[%s1219_s0 + $0xb8] sm:$0xff]  ;;  %v40_v25 = vld [vmem:[%s1219_s0 + $0xd0] sm:$0xff] }
  0x17   :  { %743 = vmatpush3.bf16.msra.mxu1 %v740_v45  ;;  %v26_v26 = vld [vmem:[%s1219_s0 + $0x60] sm:$0xff]  ;;  %v43_v28 = vld [vmem:[%s1219_s0 + $0xe8] sm:$0xff]  ;;  %v29_v30 = vld [vmem:[%s1219_s0 + $0x78] sm:$0xff] }
  0x18   :  { %745 = vmatprep.subr.bf16.mxu1 %v744_v56  ;;  %v30_v27 = vld [vmem:[%s1219_s0 + $0x80] sm:$0xff]  ;;  %v33_v31 = vld [vmem:[%s1219_s0 + $0x98] sm:$0xff]  ;;  %v52_v33 = vld [vmem:[%s1219_s0 + $0x130] sm:$0xff] }
  0x19   :  { %715 = vmatpush3.bf16.msra.mxu0 %v714_v57  ;;  %v46_v29 = vld [vmem:[%s1219_s0 + $0x100] sm:$0xff]  ;;  %v49_v32 = vld [vmem:[%s1219_s0 + $0x118] sm:$0xff]  ;;  %v32_v34 = vld [vmem:[%s1219_s0 + $0x90] sm:$0xff] }
  0x1a   :  { %717 = vmatprep.subr.bf16.mxu0 %v716_v60  ;;  %v36_v35 = vld [vmem:[%s1219_s0 + $0xb0] sm:$0xff]  ;;  %v55_v36 = vld [vmem:[%s1219_s0 + $0x148] sm:$0xff]  ;;  %v58_v37 = vld [vmem:[%s1219_s0 + $0x160] sm:$0xff] }
  0x1b   :  { %747 = vmatpush3.bf16.msra.mxu1 %v744_v56  ;;  %v35_v38 = vld [vmem:[%s1219_s0 + $0xa8] sm:$0xff]  ;;  %v61_v40 = vld [vmem:[%s1219_s0 + $0x178] sm:$0xff]  ;;  %v38_v41 = vld [vmem:[%s1219_s0 + $0xc0] sm:$0xff] }
  0x1c   :  { %749 = vmatprep.subr.bf16.mxu1 %v748_v1  ;;  %v39_v39 = vld [vmem:[%s1219_s0 + $0xc8] sm:$0xff]  ;;  %v42_v42 = vld [vmem:[%s1219_s0 + $0xe0] sm:$0xff]  ;;  %v41_v43 = vld [vmem:[%s1219_s0 + $0xd8] sm:$0xff] }
  0x1d   :  { %719 = vmatpush3.bf16.msra.mxu0 %v718_v2  ;;  %v45_v44 = vld [vmem:[%s1219_s0 + $0xf8] sm:$0xff]  ;;  %v44_v45 = vld [vmem:[%s1219_s0 + $0xf0] sm:$0xff]  ;;  %v47_v47 = vld [vmem:[%s1219_s0 + $0x108] sm:$0xff] }
  0x1e   :  { %721 = vmatprep.subr.bf16.mxu0 %v720_v5  ;;  %v48_v46 = vld [vmem:[%s1219_s0 + $0x110] sm:$0xff]  ;;  %v51_v48 = vld [vmem:[%s1219_s0 + $0x128] sm:$0xff]  ;;  %v50_v49 = vld [vmem:[%s1219_s0 + $0x120] sm:$0xff] }
  0x1f   :  { %751 = vmatpush3.bf16.msra.mxu1 %v748_v1  ;;  %v54_v50 = vld [vmem:[%s1219_s0 + $0x140] sm:$0xff]  ;;  %v53_v51 = vld [vmem:[%s1219_s0 + $0x138] sm:$0xff]  ;;  %v56_v53 = vld [vmem:[%s1219_s0 + $0x150] sm:$0xff] }
  0x20   :  { %753 = vmatprep.subr.bf16.mxu1 %v752_v8  ;;  %v57_v52 = vld [vmem:[%s1219_s0 + $0x158] sm:$0xff]  ;;  %v60_v54 = vld [vmem:[%s1219_s0 + $0x170] sm:$0xff]  ;;  %v59_v55 = vld [vmem:[%s1219_s0 + $0x168] sm:$0xff] }
  0x21   :  { %723 = vmatpush3.bf16.msra.mxu0 %v722_v9  ;;  %v1131_v58 = vld [vmem:[%s1220_s2] ss:$0 sm:$0xff] }
  0x23   :  { %755 = vmatpush3.bf16.msra.mxu1 %v752_v8 }
  0x24   :  { %182 = vmatmul.mubr.f32.vlgmr.msra.gmra.mrb[0].mxu0 %v14_v10 }
  0x25   :  { %186 = vmatprep.mubr.f32.mxu0 %v18_v11 }
  0x26   :  { %669 = vmatmul.mubr.f32.vlgmr.msra.gmra.mrb[0].mxu1 %v19_v12 }
  0x27   :  { %671 = vmatprep.mubr.f32.mxu1 %v22_v13 }
  0x28   :  { %187 = vmatmul.mubr.f32.gmra.mrb[2].mxu0 %v17_v14 }
  0x29   :  { %191 = vmatprep.mubr.f32.mxu0 %v21_v15 }
  0x2a   :  { %672 = vmatmul.mubr.f32.gmra.mrb[2].mxu1 %v25_v16 }
  0x2b   :  { %674 = vmatprep.mubr.f32.mxu1 %v28_v17 }
  0x2c   :  { %192 = vmatmul.mubr.f32.gmra.mrb[4].mxu0 %v20_v18 }
  0x2d   :  { %196 = vmatprep.mubr.f32.mxu0 %v24_v19 }
  0x2e   :  { %675 = vmatmul.mubr.f32.gmra.mrb[4].mxu1 %v31_v20 }
  0x2f   :  { %677 = vmatprep.mubr.f32.mxu1 %v34_v21 }
  0x30   :  { %197 = vmatmul.mubr.f32.gmra.mrb[6].mxu0 %v23_v22 }
  0x31   :  { %201 = vmatprep.mubr.f32.mxu0 %v27_v23 }
  0x32   :  { %678 = vmatmul.mubr.f32.gmra.mrb[6].mxu1 %v37_v24 }
  0x33   :  { %680 = vmatprep.mubr.f32.mxu1 %v40_v25 }
  0x34   :  { %202 = vmatmul.mubr.f32.gmra.mrb[8].mxu0 %v26_v26 }
  0x35   :  { %206 = vmatprep.mubr.f32.mxu0 %v30_v27 }
  0x36   :  { %681 = vmatmul.mubr.f32.gmra.mrb[8].mxu1 %v43_v28 }
  0x37   :  { %683 = vmatprep.mubr.f32.mxu1 %v46_v29 }
  0x38   :  { %207 = vmatmul.mubr.f32.gmra.mrb[10].mxu0 %v29_v30 }
  0x39   :  { %211 = vmatprep.mubr.f32.mxu0 %v33_v31 }
  0x3a   :  { %684 = vmatmul.mubr.f32.gmra.mrb[10].mxu1 %v49_v32 }
  0x3b   :  { %686 = vmatprep.mubr.f32.mxu1 %v52_v33 }
  0x3c   :  { %212 = vmatmul.mubr.f32.gmra.mrb[12].mxu0 %v32_v34 }
  0x3d   :  { %216 = vmatprep.mubr.f32.mxu0 %v36_v35 }
  0x3e   :  { %687 = vmatmul.mubr.f32.gmra.mrb[12].mxu1 %v55_v36 }
  0x3f   :  { %689 = vmatprep.mubr.f32.mxu1 %v58_v37 }
  0x40   :  { %217 = vmatmul.mubr.f32.gmra.mrb[14].mxu0 %v35_v38 }
  0x41   :  { %221 = vmatprep.mubr.f32.mxu0 %v39_v39 }
  0x42   :  { %690 = vmatmul.mubr.f32.gmra.mrb[14].mxu1 %v61_v40 }
  0x44   :  { %222 = vmatmul.mubr.f32.gmra.mrb[16].mxu0 %v38_v41 }
  0x45   :  { %226 = vmatprep.mubr.f32.mxu0 %v42_v42 }
  0x48   :  { %227 = vmatmul.mubr.f32.gmra.mrb[18].mxu0 %v41_v43 }
  0x49   :  { %231 = vmatprep.mubr.f32.mxu0 %v45_v44 }
  0x4c   :  { %232 = vmatmul.mubr.f32.gmra.mrb[20].mxu0 %v44_v45 }
  0x4d   :  { %236 = vmatprep.mubr.f32.mxu0 %v48_v46 }
  0x50   :  { %237 = vmatmul.mubr.f32.gmra.mrb[22].mxu0 %v47_v47 }
  0x51   :  { %241 = vmatprep.mubr.f32.mxu0 %v51_v48 }
  0x54   :  { %242 = vmatmul.mubr.f32.gmra.mrb[24].mxu0 %v50_v49 }
  0x55   :  { %246 = vmatprep.mubr.f32.mxu0 %v54_v50 }
  0x58   :  { %247 = vmatmul.mubr.f32.gmra.mrb[26].mxu0 %v53_v51 }
  0x59   :  { %251 = vmatprep.mubr.f32.mxu0 %v57_v52 }
  0x5c   :  { %252 = vmatmul.mubr.f32.gmra.mrb[28].mxu0 %v56_v53 }
  0x5d   :  { %256 = vmatprep.mubr.f32.mxu0 %v60_v54 }
  0x60   :  { %257 = vmatmul.mubr.f32.gmra.mrb[30].mxu0 %v59_v55 }
  0xf7   :  { %v556_v56 = vpop.f32.mrb[0].mxu0 }
  0xf8   :  { %v557_v57 = vpop.f32.mrb[1].mxu0 }
  0xf9   :  { %v558_v59 = vadd.f32 %v557_v57, %v556_v56  ;;  %v670_v60 = vpop.f32.mrb[0].mxu1 }
  0xfa   :  { %v328_v61 = vpop.f32.mrb[1].mxu1 }
  0xfb   :  { %v559_v62 = vpop.f32.mrb[2].mxu0  ;;  %v184_v63 = vadd.f32 %v558_v59, %v1131_v58 }
  0xfc   :  { %v560_v0 = vpop.f32.mrb[3].mxu0 }
  0xfd   :  { %v561_v1 = vadd.f32 %v560_v0, %v559_v62  ;;  %v329_v2 = vadd.f32 %v328_v61, %v184_v63  ;;  %v673_v3 = vpop.f32.mrb[2].mxu1 }
  0xfe   :  { %v338_v4 = vpop.f32.mrb[3].mxu1 }
  0xff   :  { %v189_v5 = vadd.f32 %v561_v1, %v1131_v58  ;;  %v407_v6 = vsub.f32 0.0, %v329_v2  ;;  %v562_v7 = vpop.f32.mrb[4].mxu0 }
 0x100   :  { %v563_v8 = vpop.f32.mrb[5].mxu0 }
 0x101   :  { %v334_v9 = vadd.f32 %v670_v60, %v189_v5  ;;  %v423_v10 = vmul.f32 1.442695, %v407_v6  ;;  %v564_v11 = vadd.f32 %v563_v8, %v562_v7  ;;  %v676_v12 = vpop.f32.mrb[4].mxu1 }
 0x102   :  { %v348_v13 = vpop.f32.mrb[5].mxu1 }
 0x103   :  { %v408_v14 = vsub.f32 0.0, %v334_v9  ;;  %756 = vpow2.f32 %v423_v10  ;;  %v565_v15 = vpop.f32.mrb[6].mxu0  ;;  %v194_v16 = vadd.f32 %v564_v11, %v1131_v58 }
 0x104   :  { %v566_v17 = vpop.f32.mrb[7].mxu0 }
 0x105   :  { %v425_v18 = vmul.f32 1.442695, %v408_v14  ;;  %v567_v19 = vadd.f32 %v566_v17, %v565_v15  ;;  %v339_v20 = vadd.f32 %v338_v4, %v194_v16  ;;  %v679_v21 = vpop.f32.mrb[6].mxu1 }
 0x106   :  { %v358_v22 = vpop.f32.mrb[7].mxu1 }
 0x107   :  { %758 = vpow2.f32 %v425_v18  ;;  %v199_v23 = vadd.f32 %v567_v19, %v1131_v58  ;;  %v409_v24 = vsub.f32 0.0, %v339_v20  ;;  %v568_v25 = vpop.f32.mrb[8].mxu0 }
 0x108   :  { %v569_v26 = vpop.f32.mrb[9].mxu0 }
 0x109   :  { %v344_v27 = vadd.f32 %v673_v3, %v199_v23  ;;  %v427_v28 = vmul.f32 1.442695, %v409_v24  ;;  %v570_v29 = vadd.f32 %v569_v26, %v568_v25  ;;  %v1137_v30 = vpop.f32.mrb[8].mxu1 }
 0x10a   :  { %v368_v31 = vpop.f32.mrb[9].mxu1 }
 0x10b   :  { %v410_v32 = vsub.f32 0.0, %v344_v27  ;;  %760 = vpow2.f32 %v427_v28  ;;  %v571_v33 = vpop.f32.mrb[10].mxu0  ;;  %v204_v34 = vadd.f32 %v570_v29, %v1131_v58 }
 0x10c   :  { %v572_v35 = vpop.f32.mrb[11].mxu0 }
 0x10d   :  { %v757_v36 = vpop.eup %756  ;;  %v429_v37 = vmul.f32 1.442695, %v410_v32  ;;  %v573_v38 = vadd.f32 %v572_v35, %v571_v33  ;;  %v349_v39 = vadd.f32 %v348_v13, %v204_v34  ;;  %v1140_v40 = vpop.f32.mrb[10].mxu1 }
 0x10e   :  { %v455_v41 = vadd.f32 1.0, %v757_v36  ;;  %v1142_v42 = vpop.f32.mrb[11].mxu1 }
 0x10f   :  { %762 = vpow2.f32 %v429_v37  ;;  %v209_v43 = vadd.f32 %v573_v38, %v1131_v58  ;;  %v411_v44 = vsub.f32 0.0, %v349_v39  ;;  %v574_v45 = vpop.f32.mrb[12].mxu0 }
 0x110   :  { %764 = vrcp.f32 %v455_v41  ;;  %v575_v46 = vpop.f32.mrb[13].mxu0 }
 0x111   :  { %v759_v47 = vpop.eup %758  ;;  %v354_v48 = vadd.f32 %v676_v12, %v209_v43  ;;  %v431_v49 = vmul.f32 1.442695, %v411_v44  ;;  %v576_v50 = vadd.f32 %v575_v46, %v574_v45  ;;  %v1145_v51 = vpop.f32.mrb[12].mxu1 }
 0x112   :  { %v456_v52 = vadd.f32 1.0, %v759_v47  ;;  %v1147_v53 = vpop.f32.mrb[13].mxu1 }
 0x113   :  { %v412_v54 = vsub.f32 0.0, %v354_v48  ;;  %766 = vpow2.f32 %v431_v49  ;;  %v577_v55 = vpop.f32.mrb[14].mxu0  ;;  %v214_v56 = vadd.f32 %v576_v50, %v1131_v58 }
 0x114   :  { %768 = vrcp.f32 %v456_v52  ;;  %v578_v57 = vpop.f32.mrb[15].mxu0 }
 0x115   :  { %v761_v59 = vpop.eup %760  ;;  %v433_v60 = vmul.f32 1.442695, %v412_v54  ;;  %v579_v61 = vadd.f32 %v578_v57, %v577_v55  ;;  %v359_v62 = vadd.f32 %v358_v22, %v214_v56  ;;  %v1150_v63 = vpop.f32.mrb[14].mxu1 }
 0x116   :  { %v457_v0 = vadd.f32 1.0, %v761_v59  ;;  %v1152_v1 = vpop.f32.mrb[15].mxu1 }
 0x117   :  { %770 = vpow2.f32 %v433_v60  ;;  %v219_v2 = vadd.f32 %v579_v61, %v1131_v58  ;;  %v413_v3 = vsub.f32 0.0, %v359_v62  ;;  %v580_v4 = vpop.f32.mrb[16].mxu0 }
 0x118   :  { %772 = vrcp.f32 %v457_v0  ;;  %v581_v5 = vpop.f32.mrb[17].mxu0 }
 0x119   :  { %v763_v6 = vpop.eup %762  ;;  %v364_v7 = vadd.f32 %v679_v21, %v219_v2  ;;  %v435_v8 = vmul.f32 1.442695, %v413_v3  ;;  %v582_v9 = vadd.f32 %v581_v5, %v580_v4 }
 0x11a   :  { %v765_v10 = vpop.eup %764  ;;  %v458_v11 = vadd.f32 1.0, %v763_v6 }
 0x11b   :  { %503 = vst [vmem:[%s1221_s3] sm:$0xff] %v765_v10  ;;  %v414_v12 = vsub.f32 0.0, %v364_v7  ;;  %774 = vpow2.f32 %v435_v8  ;;  %v583_v13 = vpop.f32.mrb[18].mxu0  ;;  %v224_v14 = vadd.f32 %v582_v9, %v1131_v58 }
 0x11c   :  { %776 = vrcp.f32 %v458_v11  ;;  %v584_v15 = vpop.f32.mrb[19].mxu0 }
 0x11d   :  { %v767_v16 = vpop.eup %766  ;;  %v437_v17 = vmul.f32 1.442695, %v414_v12  ;;  %v585_v18 = vadd.f32 %v584_v15, %v583_v13  ;;  %v369_v19 = vadd.f32 %v368_v31, %v224_v14 }
 0x11e   :  { %v769_v20 = vpop.eup %768  ;;  %v459_v21 = vadd.f32 1.0, %v767_v16 }
 0x11f   :  { %504 = vst [vmem:[%s1221_s3 + $0x8] sm:$0xff] %v769_v20  ;;  %778 = vpow2.f32 %v437_v17  ;;  %v229_v22 = vadd.f32 %v585_v18, %v1131_v58  ;;  %v415_v23 = vsub.f32 0.0, %v369_v19  ;;  %v586_v24 = vpop.f32.mrb[20].mxu0 }
 0x120   :  { %780 = vrcp.f32 %v459_v21  ;;  %v587_v25 = vpop.f32.mrb[21].mxu0 }
 0x121   :  { %v771_v26 = vpop.eup %770  ;;  %v374_v27 = vadd.f32 %v1137_v30, %v229_v22  ;;  %v439_v28 = vmul.f32 1.442695, %v415_v23  ;;  %v588_v29 = vadd.f32 %v587_v25, %v586_v24 }
 0x122   :  { %v773_v32 = vpop.eup %772  ;;  %v460_v31 = vadd.f32 1.0, %v771_v26 }
 0x123   :  { %505 = vst [vmem:[%s1221_s3 + $0x10] sm:$0xff] %v773_v32  ;;  %v416_v33 = vsub.f32 0.0, %v374_v27  ;;  %782 = vpow2.f32 %v439_v28  ;;  %v589_v34 = vpop.f32.mrb[22].mxu0  ;;  %v234_v35 = vadd.f32 %v588_v29, %v1131_v58 }
 0x124   :  { %784 = vrcp.f32 %v460_v31  ;;  %v590_v36 = vpop.f32.mrb[23].mxu0 }
 0x125   :  { %v775_v37 = vpop.eup %774  ;;  %v441_v38 = vmul.f32 1.442695, %v416_v33  ;;  %v591_v39 = vadd.f32 %v590_v36, %v589_v34  ;;  %v379_v30 = vadd.f32 %v1142_v42, %v234_v35 }
 0x126   :  { %v777_v41 = vpop.eup %776  ;;  %v461_v43 = vadd.f32 1.0, %v775_v37 }
 0x127   :  { %506 = vst [vmem:[%s1221_s3 + $0x18] sm:$0xff] %v777_v41  ;;  %786 = vpow2.f32 %v441_v38  ;;  %v239_v44 = vadd.f32 %v591_v39, %v1131_v58  ;;  %v417_v45 = vsub.f32 0.0, %v379_v30  ;;  %v592_v46 = vpop.f32.mrb[24].mxu0 }
 0x128   :  { %788 = vrcp.f32 %v461_v43  ;;  %v593_v47 = vpop.f32.mrb[25].mxu0 }
 0x129   :  { %v779_v48 = vpop.eup %778  ;;  %v384_v49 = vadd.f32 %v1140_v40, %v239_v44  ;;  %v443_v50 = vmul.f32 1.442695, %v417_v45  ;;  %v594_v52 = vadd.f32 %v593_v47, %v592_v46 }
 0x12a   :  { %v781_v54 = vpop.eup %780  ;;  %v462_v42 = vadd.f32 1.0, %v779_v48 }
 0x12b   :  { %507 = vst [vmem:[%s1221_s3 + $0x20] sm:$0xff] %v781_v54  ;;  %v418_v55 = vsub.f32 0.0, %v384_v49  ;;  %790 = vpow2.f32 %v443_v50  ;;  %v595_v56 = vpop.f32.mrb[26].mxu0  ;;  %v244_v57 = vadd.f32 %v594_v52, %v1131_v58 }
 0x12c   :  { %792 = vrcp.f32 %v462_v42  ;;  %v596_v59 = vpop.f32.mrb[27].mxu0 }
 0x12d   :  { %v783_v60 = vpop.eup %782  ;;  %v445_v61 = vmul.f32 1.442695, %v418_v55  ;;  %v597_v62 = vadd.f32 %v596_v59, %v595_v56  ;;  %v389_v40 = vadd.f32 %v1147_v53, %v244_v57 }
 0x12e   :  { %v785_v0 = vpop.eup %784  ;;  %v463_v2 = vadd.f32 1.0, %v783_v60 }
 0x12f   :  { %508 = vst [vmem:[%s1221_s3 + $0x28] sm:$0xff] %v785_v0  ;;  %794 = vpow2.f32 %v445_v61  ;;  %v249_v3 = vadd.f32 %v597_v62, %v1131_v58  ;;  %v419_v4 = vsub.f32 0.0, %v389_v40  ;;  %v598_v5 = vpop.f32.mrb[28].mxu0 }
 0x130   :  { %796 = vrcp.f32 %v463_v2  ;;  %v599_v6 = vpop.f32.mrb[29].mxu0 }
 0x131   :  { %v787_v7 = vpop.eup %786  ;;  %v394_v8 = vadd.f32 %v1145_v51, %v249_v3  ;;  %v447_v9 = vmul.f32 1.442695, %v419_v4  ;;  %v600_v10 = vadd.f32 %v599_v6, %v598_v5 }
 0x132   :  { %v789_v11 = vpop.eup %788  ;;  %v464_v53 = vadd.f32 1.0, %v787_v7 }
 0x133   :  { %509 = vst [vmem:[%s1221_s3 + $0x30] sm:$0xff] %v789_v11  ;;  %v420_v12 = vsub.f32 0.0, %v394_v8  ;;  %798 = vpow2.f32 %v447_v9  ;;  %v601_v13 = vpop.f32.mrb[30].mxu0  ;;  %v254_v14 = vadd.f32 %v600_v10, %v1131_v58 }
 0x134   :  { %800 = vrcp.f32 %v464_v53  ;;  %v602_v15 = vpop.f32.mrb[31].mxu0 }
 0x135   :  { %v791_v16 = vpop.eup %790  ;;  %v449_v17 = vmul.f32 1.442695, %v420_v12  ;;  %v603_v18 = vadd.f32 %v602_v15, %v601_v13  ;;  %v399_v51 = vadd.f32 %v1152_v1, %v254_v14 }
 0x136   :  { %v793_v19 = vpop.eup %792  ;;  %v465_v20 = vadd.f32 1.0, %v791_v16 }
 0x137   :  { %510 = vst [vmem:[%s1221_s3 + $0x38] sm:$0xff] %v793_v19  ;;  %802 = vpow2.f32 %v449_v17  ;;  %v259_v21 = vadd.f32 %v603_v18, %v1131_v58  ;;  %v421_v22 = vsub.f32 0.0, %v399_v51 }
 0x138   :  { %804 = vrcp.f32 %v465_v20 }
 0x139   :  { %v795_v23 = vpop.eup %794  ;;  %v404_v24 = vadd.f32 %v1150_v63, %v259_v21  ;;  %v451_v25 = vmul.f32 1.442695, %v421_v22 }
 0x13a   :  { %v797_v26 = vpop.eup %796  ;;  %v466_v27 = vadd.f32 1.0, %v795_v23 }
 0x13b   :  { %511 = vst [vmem:[%s1221_s3 + $0x40] sm:$0xff] %v797_v26  ;;  %v422_v1 = vsub.f32 0.0, %v404_v24  ;;  %806 = vpow2.f32 %v451_v25 }
 0x13c   :  { %808 = vrcp.f32 %v466_v27 }
 0x13d   :  { %v799_v28 = vpop.eup %798  ;;  %v453_v29 = vmul.f32 1.442695, %v422_v1 }
 0x13e   :  { %v801_v32 = vpop.eup %800  ;;  %v467_v31 = vadd.f32 1.0, %v799_v28 }
 0x13f   :  { %512 = vst [vmem:[%s1221_s3 + $0x48] sm:$0xff] %v801_v32  ;;  %810 = vpow2.f32 %v453_v29 }
 0x140   :  { %812 = vrcp.f32 %v467_v31 }
 0x141   :  { %v803_v58 = vpop.eup %802 }
 0x142   :  { %v805_v63 = vpop.eup %804  ;;  %v468_v33 = vadd.f32 1.0, %v803_v58 }
 0x143   :  { %513 = vst [vmem:[%s1221_s3 + $0x50] sm:$0xff] %v805_v63 }
 0x144   :  { %814 = vrcp.f32 %v468_v33 }
 0x145   :  { %v807_v34 = vpop.eup %806 }
 0x146   :  { %v809_v35 = vpop.eup %808  ;;  %v469_v36 = vadd.f32 1.0, %v807_v34 }
 0x147   :  { %514 = vst [vmem:[%s1221_s3 + $0x58] sm:$0xff] %v809_v35 }
 0x148   :  { %816 = vrcp.f32 %v469_v36 }
 0x149   :  { %v811_v37 = vpop.eup %810 }
 0x14a   :  { %v813_v38 = vpop.eup %812  ;;  %v470_v39 = vadd.f32 1.0, %v811_v37 }
 0x14b   :  { %515 = vst [vmem:[%s1221_s3 + $0x60] sm:$0xff] %v813_v38 }
 0x14c   :  { %818 = vrcp.f32 %v470_v39 }
 0x14e   :  { %v815_v30 = vpop.eup %814 }
 0x14f   :  { %516 = vst [vmem:[%s1221_s3 + $0x68] sm:$0xff] %v815_v30 }
 0x152   :  { %v817_v41 = vpop.eup %816 }
 0x153   :  { %517 = vst [vmem:[%s1221_s3 + $0x70] sm:$0xff] %v817_v41 }
 0x156   :  { %v819_v43 = vpop.eup %818 }
 0x157   :  { %518 = vst [vmem:[%s1221_s3 + $0x78] sm:$0xff] %v819_v43 }

// kernel: lenet_forward.7
= control target key start
LH: loop header
LB: loop body
LE: loop exit
PB: predicated region body
PF: predicated region fallthrough
CT: control target
= control target key end

     0   :  { %s872_s1 = inlined_call_operand.vmem [shape: f32[768,128], index: 1, kind: input, shape index: {}]   ;;  %s873_s0 = inlined_call_operand.vmem [shape: f32[8,768], index: 0, kind: input, shape index: {}]   ;;  %s874_s2 = inlined_call_operand.vmem [shape: f32[1,128], index: 2, kind: input, shape index: {}]   ;;  %s875_s3 = inlined_call_operand.vmem [shape: f32[8,128], index: 3, kind: output, shape index: {}]  }
   0x1   :  { %v36_v0 = vld [vmem:[%s872_s1 + $0x80] sm:$0xff]  ;;  %v37_v1 = vld [vmem:[%s872_s1 + $0x88] sm:$0xff]  ;;  %v38_v11 = vld [vmem:[%s872_s1 + $0x90] sm:$0xff] }
   0x2   :  { %v20_v2 = vld [vmem:[%s872_s1] sm:$0xff]  ;;  %v444_v3 = vpack.c.bf16 %v37_v1, %v36_v0  ;;  %v21_v4 = vld [vmem:[%s872_s1 + $0x8] sm:$0xff]  ;;  %v39_v13 = vld [vmem:[%s872_s1 + $0x98] sm:$0xff] }
   0x3   :  { %v68_v5 = vld [vmem:[%s872_s1 + $0x180] sm:$0xff]  ;;  %v69_v6 = vld [vmem:[%s872_s1 + $0x188] sm:$0xff]  ;;  %v446_v7 = vpack.c.bf16 %v21_v4, %v20_v2  ;;  %v22_v14 = vld [vmem:[%s872_s1 + $0x10] sm:$0xff]  ;;  %v448_v16 = vpack.c.bf16 %v39_v13, %v38_v11 }
   0x4   :  { %v476_v8 = vpack.c.bf16 %v69_v6, %v68_v5  ;;  %v52_v9 = vld [vmem:[%s872_s1 + $0x100] sm:$0xff]  ;;  %v53_v10 = vld [vmem:[%s872_s1 + $0x108] sm:$0xff]  ;;  %445 = vmatprep.subr.bf16.mxu0 %v444_v3  ;;  %v23_v15 = vld [vmem:[%s872_s1 + $0x18] sm:$0xff] }
   0x5   :  { %v478_v12 = vpack.c.bf16 %v53_v10, %v52_v9  ;;  %447 = vmatpush3.bf16.msra.mxu0 %v446_v7  ;;  %v450_v17 = vpack.c.bf16 %v23_v15, %v22_v14  ;;  %v70_v18 = vld [vmem:[%s872_s1 + $0x190] sm:$0xff]  ;;  %v71_v19 = vld [vmem:[%s872_s1 + $0x198] sm:$0xff]  ;;  %v40_v23 = vld [vmem:[%s872_s1 + $0xa0] sm:$0xff] }
   0x6   :  { %477 = vmatprep.subr.bf16.mxu1 %v476_v8  ;;  %v54_v20 = vld [vmem:[%s872_s1 + $0x110] sm:$0xff]  ;;  %v480_v21 = vpack.c.bf16 %v71_v19, %v70_v18  ;;  %v55_v22 = vld [vmem:[%s872_s1 + $0x118] sm:$0xff]  ;;  %v41_v24 = vld [vmem:[%s872_s1 + $0xa8] sm:$0xff]  ;;  %449 = vmatprep.subr.bf16.mxu0 %v448_v16 }
   0x7   :  { %479 = vmatpush3.bf16.msra.mxu1 %v478_v12  ;;  %v482_v25 = vpack.c.bf16 %v55_v22, %v54_v20  ;;  %v452_v26 = vpack.c.bf16 %v41_v24, %v40_v23  ;;  %v24_v27 = vld [vmem:[%s872_s1 + $0x20] sm:$0xff]  ;;  %v25_v28 = vld [vmem:[%s872_s1 + $0x28] sm:$0xff]  ;;  %v42_v35 = vld [vmem:[%s872_s1 + $0xb0] sm:$0xff] }
   0x8   :  { %v72_v29 = vld [vmem:[%s872_s1 + $0x1a0] sm:$0xff]  ;;  %481 = vmatprep.subr.bf16.mxu1 %v480_v21  ;;  %v73_v30 = vld [vmem:[%s872_s1 + $0x1a8] sm:$0xff]  ;;  %v454_v33 = vpack.c.bf16 %v25_v28, %v24_v27  ;;  %v43_v36 = vld [vmem:[%s872_s1 + $0xb8] sm:$0xff] }
   0x9   :  { %v56_v31 = vld [vmem:[%s872_s1 + $0x120] sm:$0xff]  ;;  %v57_v32 = vld [vmem:[%s872_s1 + $0x128] sm:$0xff]  ;;  %451 = vmatpush3.bf16.msra.mxu0 %v450_v17  ;;  %v484_v34 = vpack.c.bf16 %v73_v30, %v72_v29  ;;  %v26_v37 = vld [vmem:[%s872_s1 + $0x30] sm:$0xff]  ;;  %v456_v39 = vpack.c.bf16 %v43_v36, %v42_v35 }
   0xa   :  { %453 = vmatprep.subr.bf16.mxu0 %v452_v26  ;;  %v486_v38 = vpack.c.bf16 %v57_v32, %v56_v31  ;;  %v27_v40 = vld [vmem:[%s872_s1 + $0x38] sm:$0xff]  ;;  %v74_v41 = vld [vmem:[%s872_s1 + $0x1b0] sm:$0xff]  ;;  %v44_v46 = vld [vmem:[%s872_s1 + $0xc0] sm:$0xff] }
   0xb   :  { %483 = vmatpush3.bf16.msra.mxu1 %v482_v25  ;;  %v75_v42 = vld [vmem:[%s872_s1 + $0x1b8] sm:$0xff]  ;;  %v58_v44 = vld [vmem:[%s872_s1 + $0x130] sm:$0xff]  ;;  %v45_v47 = vld [vmem:[%s872_s1 + $0xc8] sm:$0xff]  ;;  %v458_v48 = vpack.c.bf16 %v27_v40, %v26_v37 }
   0xc   :  { %485 = vmatprep.subr.bf16.mxu1 %v484_v34  ;;  %v488_v43 = vpack.c.bf16 %v75_v42, %v74_v41  ;;  %v59_v45 = vld [vmem:[%s872_s1 + $0x138] sm:$0xff]  ;;  %v76_v49 = vld [vmem:[%s872_s1 + $0x1c0] sm:$0xff]  ;;  %v77_v50 = vld [vmem:[%s872_s1 + $0x1c8] sm:$0xff]  ;;  %v460_v52 = vpack.c.bf16 %v45_v47, %v44_v46 }
   0xd   :  { %455 = vmatpush3.bf16.msra.mxu0 %v454_v33  ;;  %v490_v51 = vpack.c.bf16 %v59_v45, %v58_v44  ;;  %v28_v53 = vld [vmem:[%s872_s1 + $0x40] sm:$0xff]  ;;  %v29_v54 = vld [vmem:[%s872_s1 + $0x48] sm:$0xff]  ;;  %v492_v56 = vpack.c.bf16 %v77_v50, %v76_v49  ;;  %v46_v58 = vld [vmem:[%s872_s1 + $0xd0] sm:$0xff] }
   0xe   :  { %457 = vmatprep.subr.bf16.mxu0 %v456_v39  ;;  %v60_v55 = vld [vmem:[%s872_s1 + $0x140] sm:$0xff]  ;;  %v61_v57 = vld [vmem:[%s872_s1 + $0x148] sm:$0xff]  ;;  %v47_v59 = vld [vmem:[%s872_s1 + $0xd8] sm:$0xff]  ;;  %v462_v62 = vpack.c.bf16 %v29_v54, %v28_v53 }
   0xf   :  { %487 = vmatpush3.bf16.msra.mxu1 %v486_v38  ;;  %v78_v60 = vld [vmem:[%s872_s1 + $0x1d0] sm:$0xff]  ;;  %v79_v61 = vld [vmem:[%s872_s1 + $0x1d8] sm:$0xff]  ;;  %v494_v63 = vpack.c.bf16 %v61_v57, %v60_v55  ;;  %v464_v0 = vpack.c.bf16 %v47_v59, %v46_v58  ;;  %v48_v6 = vld [vmem:[%s872_s1 + $0xe0] sm:$0xff] }
  0x10   :  { %489 = vmatprep.subr.bf16.mxu1 %v488_v43  ;;  %v30_v1 = vld [vmem:[%s872_s1 + $0x50] sm:$0xff]  ;;  %v31_v2 = vld [vmem:[%s872_s1 + $0x58] sm:$0xff]  ;;  %v496_v4 = vpack.c.bf16 %v79_v61, %v78_v60  ;;  %v49_v7 = vld [vmem:[%s872_s1 + $0xe8] sm:$0xff] }
  0x11   :  { %459 = vmatpush3.bf16.msra.mxu0 %v458_v48  ;;  %v62_v3 = vld [vmem:[%s872_s1 + $0x150] sm:$0xff]  ;;  %v63_v5 = vld [vmem:[%s872_s1 + $0x158] sm:$0xff]  ;;  %v80_v8 = vld [vmem:[%s872_s1 + $0x1e0] sm:$0xff]  ;;  %v466_v10 = vpack.c.bf16 %v31_v2, %v30_v1  ;;  %v468_v14 = vpack.c.bf16 %v49_v7, %v48_v6 }
  0x12   :  { %461 = vmatprep.subr.bf16.mxu0 %v460_v52  ;;  %v81_v9 = vld [vmem:[%s872_s1 + $0x1e8] sm:$0xff]  ;;  %v32_v11 = vld [vmem:[%s872_s1 + $0x60] sm:$0xff]  ;;  %v498_v13 = vpack.c.bf16 %v63_v5, %v62_v3  ;;  %v50_v19 = vld [vmem:[%s872_s1 + $0xf0] sm:$0xff] }
  0x13   :  { %491 = vmatpush3.bf16.msra.mxu1 %v490_v51  ;;  %v15_v12 = vld [vmem:[%s873_s0 + $0x8] sm:$0xff]  ;;  %v64_v16 = vld [vmem:[%s872_s1 + $0x160] sm:$0xff]  ;;  %v500_v18 = vpack.c.bf16 %v81_v9, %v80_v8  ;;  %v51_v20 = vld [vmem:[%s872_s1 + $0xf8] sm:$0xff] }
  0x14   :  { %493 = vmatprep.subr.bf16.mxu1 %v492_v56  ;;  %v33_v15 = vld [vmem:[%s872_s1 + $0x68] sm:$0xff]  ;;  %187 = vmatprep.mubr.f32.mxu0 %v15_v12  ;;  %v17_v21 = vld [vmem:[%s873_s0 + $0x18] sm:$0xff]  ;;  %v82_v22 = vld [vmem:[%s872_s1 + $0x1f0] sm:$0xff]  ;;  %v472_v26 = vpack.c.bf16 %v51_v20, %v50_v19 }
  0x15   :  { %463 = vmatpush3.bf16.msra.mxu0 %v462_v62  ;;  %v65_v17 = vld [vmem:[%s872_s1 + $0x168] sm:$0xff]  ;;  %v83_v23 = vld [vmem:[%s872_s1 + $0x1f8] sm:$0xff]  ;;  %257 = vmatprep.mubr.f32.mxu1 %v17_v21  ;;  %v470_v24 = vpack.c.bf16 %v33_v15, %v32_v11  ;;  %v34_v27 = vld [vmem:[%s872_s1 + $0x70] sm:$0xff] }
  0x16   :  { %465 = vmatprep.subr.bf16.mxu0 %v464_v0  ;;  %v502_v25 = vpack.c.bf16 %v65_v17, %v64_v16  ;;  %v35_v28 = vld [vmem:[%s872_s1 + $0x78] sm:$0xff]  ;;  %v66_v29 = vld [vmem:[%s872_s1 + $0x170] sm:$0xff]  ;;  %v504_v30 = vpack.c.bf16 %v83_v23, %v82_v22  ;;  %v100_v32 = vld [vmem:[%s872_s1 + $0x280] sm:$0xff] }
  0x17   :  { %495 = vmatpush3.bf16.msra.mxu1 %v494_v63  ;;  %v67_v31 = vld [vmem:[%s872_s1 + $0x178] sm:$0xff]  ;;  %v101_v33 = vld [vmem:[%s872_s1 + $0x288] sm:$0xff]  ;;  %v474_v34 = vpack.c.bf16 %v35_v28, %v34_v27  ;;  %v84_v37 = vld [vmem:[%s872_s1 + $0x200] sm:$0xff] }
  0x18   :  { %497 = vmatprep.subr.bf16.mxu1 %v496_v4  ;;  %v506_v35 = vpack.c.bf16 %v67_v31, %v66_v29  ;;  %v508_v36 = vpack.c.bf16 %v101_v33, %v100_v32  ;;  %v85_v38 = vld [vmem:[%s872_s1 + $0x208] sm:$0xff]  ;;  %v102_v39 = vld [vmem:[%s872_s1 + $0x290] sm:$0xff]  ;;  %v103_v40 = vld [vmem:[%s872_s1 + $0x298] sm:$0xff] }
  0x19   :  { %467 = vmatpush3.bf16.msra.mxu0 %v466_v10  ;;  %v14_v41 = vld [vmem:[%s873_s0] sm:$0xff]  ;;  %v510_v42 = vpack.c.bf16 %v85_v38, %v84_v37  ;;  %v16_v43 = vld [vmem:[%s873_s0 + $0x10] sm:$0xff]  ;;  %v512_v44 = vpack.c.bf16 %v103_v40, %v102_v39  ;;  %v87_v46 = vld [vmem:[%s872_s1 + $0x218] sm:$0xff] }
  0x1a   :  { %469 = vmatprep.subr.bf16.mxu0 %v468_v14  ;;  %v86_v45 = vld [vmem:[%s872_s1 + $0x210] sm:$0xff]  ;;  %v104_v47 = vld [vmem:[%s872_s1 + $0x2a0] sm:$0xff]  ;;  %v105_v48 = vld [vmem:[%s872_s1 + $0x2a8] sm:$0xff] }
  0x1b   :  { %499 = vmatpush3.bf16.msra.mxu1 %v498_v13  ;;  %v19_v49 = vld [vmem:[%s873_s0 + $0x28] sm:$0xff]  ;;  %v514_v50 = vpack.c.bf16 %v87_v46, %v86_v45  ;;  %v516_v51 = vpack.c.bf16 %v105_v48, %v104_v47  ;;  %v88_v52 = vld [vmem:[%s872_s1 + $0x220] sm:$0xff]  ;;  %v106_v54 = vld [vmem:[%s872_s1 + $0x2b0] sm:$0xff] }
  0x1c   :  { %501 = vmatprep.subr.bf16.mxu1 %v500_v18  ;;  %v89_v53 = vld [vmem:[%s872_s1 + $0x228] sm:$0xff]  ;;  %v107_v55 = vld [vmem:[%s872_s1 + $0x2b8] sm:$0xff]  ;;  %v90_v58 = vld [vmem:[%s872_s1 + $0x230] sm:$0xff] }
  0x1d   :  { %471 = vmatpush3.bf16.msra.mxu0 %v470_v24  ;;  %v518_v56 = vpack.c.bf16 %v89_v53, %v88_v52  ;;  %v520_v57 = vpack.c.bf16 %v107_v55, %v106_v54  ;;  %v91_v59 = vld [vmem:[%s872_s1 + $0x238] sm:$0xff]  ;;  %v108_v60 = vld [vmem:[%s872_s1 + $0x2c0] sm:$0xff]  ;;  %v109_v61 = vld [vmem:[%s872_s1 + $0x2c8] sm:$0xff] }
  0x1e   :  { %473 = vmatprep.subr.bf16.mxu0 %v472_v26  ;;  %v522_v62 = vpack.c.bf16 %v91_v59, %v90_v58  ;;  %v524_v63 = vpack.c.bf16 %v109_v61, %v108_v60  ;;  %v92_v0 = vld [vmem:[%s872_s1 + $0x240] sm:$0xff]  ;;  %v93_v1 = vld [vmem:[%s872_s1 + $0x248] sm:$0xff]  ;;  %v110_v2 = vld [vmem:[%s872_s1 + $0x2d0] sm:$0xff] }
  0x1f   :  { %503 = vmatpush3.bf16.msra.mxu1 %v502_v25  ;;  %v111_v3 = vld [vmem:[%s872_s1 + $0x2d8] sm:$0xff]  ;;  %v526_v4 = vpack.c.bf16 %v93_v1, %v92_v0  ;;  %v94_v6 = vld [vmem:[%s872_s1 + $0x250] sm:$0xff]  ;;  %v112_v8 = vld [vmem:[%s872_s1 + $0x2e0] sm:$0xff] }
  0x20   :  { %505 = vmatprep.subr.bf16.mxu1 %v504_v30  ;;  %v528_v5 = vpack.c.bf16 %v111_v3, %v110_v2  ;;  %v95_v7 = vld [vmem:[%s872_s1 + $0x258] sm:$0xff]  ;;  %v113_v9 = vld [vmem:[%s872_s1 + $0x2e8] sm:$0xff]  ;;  %v96_v12 = vld [vmem:[%s872_s1 + $0x260] sm:$0xff] }
  0x21   :  { %475 = vmatpush3.bf16.msra.mxu0 %v474_v34  ;;  %v530_v10 = vpack.c.bf16 %v95_v7, %v94_v6  ;;  %v532_v11 = vpack.c.bf16 %v113_v9, %v112_v8  ;;  %v97_v13 = vld [vmem:[%s872_s1 + $0x268] sm:$0xff]  ;;  %v114_v14 = vld [vmem:[%s872_s1 + $0x2f0] sm:$0xff]  ;;  %v115_v15 = vld [vmem:[%s872_s1 + $0x2f8] sm:$0xff] }
  0x22   :  { %509 = vmatprep.subr.bf16.mxu0 %v508_v36  ;;  %v534_v16 = vpack.c.bf16 %v97_v13, %v96_v12  ;;  %v536_v17 = vpack.c.bf16 %v115_v15, %v114_v14  ;;  %v98_v18 = vld [vmem:[%s872_s1 + $0x270] sm:$0xff]  ;;  %v99_v19 = vld [vmem:[%s872_s1 + $0x278] sm:$0xff]  ;;  %v18_v21 = vld [vmem:[%s873_s0 + $0x20] sm:$0xff] }
  0x23   :  { %507 = vmatpush3.bf16.msra.mxu1 %v506_v35  ;;  %v538_v20 = vpack.c.bf16 %v99_v19, %v98_v18  ;;  %v338_v23 = vld [vmem:[%s874_s2] ss:$0 sm:$0xff] }
  0x24   :  { %188 = vmatmul.mubr.f32.vlgmr.msra.gmra.mrb[0].mxu0 %v14_v41 }
  0x25   :  { %511 = vmatpush3.bf16.msra.mxu0 %v510_v42  ;;  %327 = vmatprep.mubr.f32.mxu0 %v19_v49 }
  0x26   :  { %258 = vmatmul.mubr.f32.vlgmr.msra.gmra.mrb[0].mxu1 %v16_v43  ;;  %513 = vmatprep.subr.bf16.mxu0 %v512_v44 }
  0x29   :  { %515 = vmatpush3.bf16.msra.mxu0 %v514_v50 }
  0x2a   :  { %517 = vmatprep.subr.bf16.mxu0 %v516_v51 }
  0x2d   :  { %519 = vmatpush3.bf16.msra.mxu0 %v518_v56 }
  0x2e   :  { %521 = vmatprep.subr.bf16.mxu0 %v520_v57 }
  0x31   :  { %523 = vmatpush3.bf16.msra.mxu0 %v522_v62 }
  0x32   :  { %525 = vmatprep.subr.bf16.mxu0 %v524_v63 }
  0x35   :  { %527 = vmatpush3.bf16.msra.mxu0 %v526_v4 }
  0x36   :  { %529 = vmatprep.subr.bf16.mxu0 %v528_v5 }
  0x39   :  { %531 = vmatpush3.bf16.msra.mxu0 %v530_v10 }
  0x3a   :  { %533 = vmatprep.subr.bf16.mxu0 %v532_v11 }
  0x3d   :  { %535 = vmatpush3.bf16.msra.mxu0 %v534_v16 }
  0x3e   :  { %537 = vmatprep.subr.bf16.mxu0 %v536_v17 }
  0x41   :  { %539 = vmatpush3.bf16.msra.mxu0 %v538_v20 }
  0x44   :  { %328 = vmatmul.mubr.f32.vlgmr.msra.gmra.mrb[2].mxu0 %v18_v21 }
  0xf7   :  { %v371_v22 = vpop.f32.mrb[0].mxu0 }
  0xf8   :  { %v372_v24 = vpop.f32.mrb[1].mxu0 }
  0xf9   :  { %v406_v25 = vpop.f32.mrb[0].mxu1  ;;  %v373_v26 = vadd.f32 %v372_v24, %v371_v22 }
  0xfa   :  { %v407_v27 = vpop.f32.mrb[1].mxu1 }
  0xfb   :  { %v408_v28 = vadd.f32 %v407_v27, %v406_v25  ;;  %v190_v29 = vadd.f32 %v373_v26, %v338_v23 }
  0xfd   :  { %v260_v30 = vadd.f32 %v408_v28, %v190_v29 }
 0x117   :  { %v441_v31 = vpop.f32.mrb[2].mxu0 }
 0x118   :  { %v442_v32 = vpop.f32.mrb[3].mxu0 }
 0x119   :  { %v443_v33 = vadd.f32 %v442_v32, %v441_v31 }
 0x11b   :  { %v330_v34 = vadd.f32 %v443_v33, %v260_v30 }
 0x11d   :  { %333 = vst [vmem:[%s875_s3] sm:$0xff] %v330_v34 }

</bundles_post_ra>
